<compile_context>
chip_gen: v7x
topology: tpu7x:2x2x1
jax: 0.10.0
libtpu: 0.0.40
codegen_flags: <defaults>
</compile_context>

<pallas_src>
import functools
import math

import numpy as np
import jax
import jax.numpy as jnp
from jax import lax
from jax.experimental import pallas as pl
from jax.experimental.pallas import tpu as pltpu

LANES = 128
NEG_BIG = -1e30


# ------------------------------ fused kernel -------------------------------

def _make_fused_kernel(*, N, B, F, ks_levels):
    """Build the single fused forward kernel (closure over static sizes and the static
    per-level / per-graph top-k counts ks_levels[level][graph])."""
    num_levels = len(ks_levels)

    def kernel(a_ref, x_ref, member_ref,
               wrel_ref, wroot_ref, cb_ref, pw_ref,
               w1_ref, b1_ref, w2_ref, b2_ref, w3_ref, b3_ref,
               o_ref):
        A = a_ref[...]                       # (N, N) dense adjacency  A[dst, src]
        x = x_ref[...]                       # (N, F) lane-padded node features
        member = member_ref[...]             # (B, N) member[b, i] = 1. iff batch[i] == b

        # ---- static index helpers (built from iota; no dense constants embedded) ----
        ii = lax.broadcasted_iota(jnp.int32, (N, N), 0)       # row index i
        jj = lax.broadcasted_iota(jnp.int32, (N, N), 1)       # col index j
        eye = (ii == jj).astype(jnp.float32)                  # (N, N) identity mask

        def col_to_row(v_col):               # (N,1) -> (1,N), bit-exact layout "transpose"
            return jnp.sum(eye * v_col, axis=0, keepdims=True)

        def row_to_col(v_row):               # (1,N) -> (N,1), bit-exact layout "transpose"
            return jnp.sum(eye * v_row, axis=1, keepdims=True)

        # per-graph membership as columns + same-graph matrix (sum of B outer products)
        member_cols = [row_to_col(member[b:b + 1, :]) for b in range(B)]      # B x (N,1)
        same_g = member_cols[0] * member[0:1, :]
        for b in range(1, B):
            same_g = same_g + member_cols[b] * member[b:b + 1, :]             # (N, N)

        valid_col = jnp.ones((N, 1), jnp.float32)    # nodes still alive after pooling
        valid_row = jnp.ones((1, N), jnp.float32)
        acc_max = jnp.zeros((B, F), jnp.float32)     # sum over levels of global_max_pool
        acc_mean = jnp.zeros((B, F), jnp.float32)    # sum over levels of global_mean_pool

        for lvl in range(num_levels):
            ks = ks_levels[lvl]

            # ---- GraphConv(aggr='add') + ReLU ------------------------------------
            # dropped nodes have zero rows in x, so their edges contribute nothing.
            aggr = jnp.dot(A, x, preferred_element_type=jnp.float32)          # (N, F)
            h = (jnp.dot(aggr, wrel_ref[lvl], preferred_element_type=jnp.float32)
                 + jnp.dot(x, wroot_ref[lvl], preferred_element_type=jnp.float32)
                 + cb_ref[lvl])
            h = jnp.maximum(h, 0.0)

            # ---- TopKPooling score: s = tanh(h @ w / ||w||) (pw pre-scaled, XLU reduce)
            s_col = jnp.tanh(jnp.sum(h * pw_ref[lvl], axis=1, keepdims=True))  # (N, 1)
            s_row = col_to_row(s_col)                                          # (1, N)

            # ---- in-kernel top-k keep mask: rank-within-graph < k -----------------
            # "n beats m" := s[n] > s[m]  or  (s[n] == s[m] and n < m)  (index tie-break)
            j_beats_i = ((s_row > s_col) | ((s_row == s_col) & (jj < ii))).astype(jnp.float32)
            i_beats_j = ((s_col > s_row) | ((s_col == s_row) & (ii < jj))).astype(jnp.float32)
            rank_col = jnp.sum(same_g * valid_row * j_beats_i, axis=1, keepdims=True)  # (N,1)
            rank_row = jnp.sum(same_g * valid_col * i_beats_j, axis=0, keepdims=True)  # (1,N)

            k_col = sum(float(ks[b]) * member_cols[b] for b in range(B))               # (N,1)
            k_row = sum(float(ks[b]) * member[b:b + 1, :] for b in range(B))           # (1,N)
            keep_col = valid_col * (rank_col < k_col).astype(jnp.float32)
            keep_row = valid_row * (rank_row < k_row).astype(jnp.float32)

            # ---- pool: x <- x[perm] * score[perm]  (masked fixed-N form) -----------
            x = h * s_col * keep_col
            valid_col, valid_row = keep_col, keep_row

            # ---- readout: [global_max_pool | global_mean_pool], accumulated --------
            # mean: exact static 1/k_b folded into the (B,N) weight, one MXU dot.
            inv_row = sum((1.0 / float(ks[b])) * member[b:b + 1, :] for b in range(B))
            w_mean = member * (keep_row * inv_row)                              # (B, N)
            acc_mean = acc_mean + jnp.dot(w_mean, x, preferred_element_type=jnp.float32)
            # max: per-graph masked max (ceil(ratio*n) >= 1 so every graph keeps >= 1 node
            # and the -1e30 identity never leaks).  Accumulated in registers, no stores.
            max_rows = []
            for b in range(B):
                mcol = member_cols[b] * keep_col                                # (N, 1)
                max_rows.append(jnp.max(jnp.where(mcol > 0.0, x, NEG_BIG),
                                        axis=0, keepdims=True))                 # (1, F)
            acc_max = acc_max + jnp.concatenate(max_rows, axis=0)               # (B, F)

        # ---- MLP head: lin1 -> relu -> dropout -> lin2 -> relu -> lin3 -> log_softmax
        # cat([gmp | gap]) folded into the two halves of lin1's weight (no concat).
        # TODO(synk): dropout is identity (eval mode); training-mode RNG dropout not implemented.
        h1 = (jnp.dot(acc_max, w1_ref[0:F, :], preferred_element_type=jnp.float32)
              + jnp.dot(acc_mean, w1_ref[F:2 * F, :], preferred_element_type=jnp.float32)
              + b1_ref[...])
        h1 = jnp.maximum(h1, 0.0)
        h2 = jnp.maximum(jnp.dot(h1, w2_ref[...], preferred_element_type=jnp.float32)
                         + b2_ref[...], 0.0)
        logits = jnp.dot(h2, w3_ref[...], preferred_element_type=jnp.float32) + b3_ref[...]
        m = jnp.max(logits, axis=-1, keepdims=True)
        lse = jnp.log(jnp.sum(jnp.exp(logits - m), axis=-1, keepdims=True)) + m
        o_ref[...] = logits - lse            # (B, 128) lane-padded log-probs

    return kernel


# --------------------------- pallas_call wrapper ----------------------------

def _vmem():
    return pl.BlockSpec(memory_space=pltpu.MemorySpace.VMEM)


def net_forward(params, x, A, batch, *, graph_sizes, num_classes, ratio=0.8):
    N, f_in = x.shape
    B = len(graph_sizes)
    F = LANES
    if f_in < F:                                           # lane-dense feature tiles everywhere
        x = jnp.pad(x, ((0, 0), (0, F - f_in)))
    member = (batch[None, :] ==
              jnp.arange(B, dtype=batch.dtype)[:, None]).astype(jnp.float32)   # (B, N)

    # static per-level / per-graph kept-node counts: k = ceil(ratio * n_valid)
    ks_levels = []
    n_valid = list(graph_sizes)
    for _ in range(3):
        ks = [int(math.ceil(ratio * n)) for n in n_valid]
        ks_levels.append(ks)
        n_valid = ks

    kernel = _make_fused_kernel(N=N, B=B, F=F, ks_levels=ks_levels)

    flops = (3 * (2 * N * N * F + 2 * 2 * N * F * F + 2 * B * N * F + 8 * N * N)
             + 2 * B * (2 * F * F + F * 64 + 64 * F))
    bytes_accessed = 4 * (N * N + N * F + B * N
                          + 3 * (2 * F * F + 2 * F)
                          + 2 * F * F + F + F * 64 + 64 + 64 * F + F
                          + B * F)
    cost = pl.CostEstimate(flops=flops, transcendentals=3 * N + B * F,
                           bytes_accessed=bytes_accessed)

    out = pl.pallas_call(
        kernel,
        out_shape=jax.ShapeDtypeStruct((B, LANES), jnp.float32),
        in_specs=[_vmem()] * 13,
        out_specs=_vmem(),
        cost_estimate=cost,
    )(A, x, member,
      params["wrel"], params["wroot"], params["cbias"], params["pw"],
      params["w1"], params["b1"], params["w2"], params["b2"],
      params["w3"], params["b3"])
    return out[:, :num_classes]


# ------------------------------- parameters ---------------------------------

def init_params(key, num_features, num_classes, hidden=128):
    def lin(k, fi, fo):
        return jax.random.normal(k, (fi, fo), jnp.float32) / jnp.sqrt(float(fi))

    keys = jax.random.split(key, 16)
    wrel, wroot, cbias, pw = [], [], [], []
    dims = [(num_features, hidden), (hidden, hidden), (hidden, hidden)]
    for i, (fi, fo) in enumerate(dims):
        wr = lin(keys[3 * i + 0], fi, fo)
        ws = lin(keys[3 * i + 1], fi, fo)
        fi_pad = max(fi, LANES)               # conv input features lane-padded to 128
        wrel.append(jnp.zeros((fi_pad, fo), jnp.float32).at[:fi, :].set(wr))
        wroot.append(jnp.zeros((fi_pad, fo), jnp.float32).at[:fi, :].set(ws))
        cbias.append(jnp.zeros((1, fo), jnp.float32))
        pool_w = jax.random.normal(keys[3 * i + 2], (fo, 1), jnp.float32)
        # 1/||pool_w|| precomputed once and folded into the stored scoring row
        pw.append((pool_w[:, 0] * jax.lax.rsqrt(jnp.sum(pool_w * pool_w)))[None, :])
    p = {"wrel": jnp.stack(wrel), "wroot": jnp.stack(wroot),
         "cbias": jnp.stack(cbias), "pw": jnp.stack(pw)}                 # (3,128,128)/(3,1,128)
    p["w1"] = lin(keys[9], 2 * hidden, hidden)                           # rows: [max | mean]
    p["b1"] = jnp.zeros((1, hidden), jnp.float32)
    p["w2"] = lin(keys[10], hidden, 64)
    p["b2"] = jnp.zeros((1, 64), jnp.float32)
    w3 = lin(keys[11], 64, num_classes)
    # class dim lane-padded to 128; padded logits forced to -1e30 via the padded bias
    p["w3"] = jnp.zeros((64, LANES), jnp.float32).at[:, :num_classes].set(w3)
    p["b3"] = jnp.full((1, LANES), NEG_BIG, jnp.float32).at[0, :num_classes].set(0.0)
    return p


# ---------------------------------- main ------------------------------------

if __name__ == "__main__":
    num_features, num_classes = 16, 6
    graph_sizes = (12, 12)                    # 2 graphs, 24 nodes total (multiple of 8)
    N = sum(graph_sizes)
    B = len(graph_sizes)

    key = jax.random.PRNGKey(0)
    k_feat, k_param = jax.random.split(key)

    # node features (N, F)
    x = jax.random.normal(k_feat, (N, num_features), jnp.float32)

    # batch vector + dense adjacency A[dst, src]: bidirectional ring + one chord per graph
    batch_np = np.concatenate([np.full((n,), b, np.int32)
                               for b, n in enumerate(graph_sizes)])
    A_np = np.zeros((N, N), np.float32)
    off = 0
    for n in graph_sizes:
        for i in range(n):
            j = (i + 1) % n
            A_np[off + j, off + i] = 1.0
            A_np[off + i, off + j] = 1.0
        A_np[off + 0, off + n // 2] = 1.0
        A_np[off + n // 2, off + 0] = 1.0
        off += n
    A = jnp.asarray(A_np)
    batch = jnp.asarray(batch_np)

    params = init_params(k_param, num_features, num_classes)

    fwd = jax.jit(functools.partial(net_forward,
                                    graph_sizes=graph_sizes,
                                    num_classes=num_classes))
    out = jax.block_until_ready(fwd(params, x, A, batch))

    assert out.shape == (B, num_classes)
    # rows of log_softmax must (approximately) sum to 1 in prob space
    assert bool(jnp.all(jnp.abs(jnp.sum(jnp.exp(out), axis=-1) - 1.0) < 1e-4))
    print("KERNEL_OK")
</pallas_src>

<mosaic_0001>
module attributes {stable_mosaic.version = 11 : i64} {
  func.func @kernel(%arg0: memref<24x24xf32, #tpu.memory_space<vmem>>, %arg1: memref<24x128xf32, #tpu.memory_space<vmem>>, %arg2: memref<2x24xf32, #tpu.memory_space<vmem>>, %arg3: memref<3x128x128xf32, #tpu.memory_space<vmem>>, %arg4: memref<3x128x128xf32, #tpu.memory_space<vmem>>, %arg5: memref<3x1x128xf32, #tpu.memory_space<vmem>>, %arg6: memref<3x1x128xf32, #tpu.memory_space<vmem>>, %arg7: memref<256x128xf32, #tpu.memory_space<vmem>>, %arg8: memref<1x128xf32, #tpu.memory_space<vmem>>, %arg9: memref<128x64xf32, #tpu.memory_space<vmem>>, %arg10: memref<1x64xf32, #tpu.memory_space<vmem>>, %arg11: memref<64x128xf32, #tpu.memory_space<vmem>>, %arg12: memref<1x128xf32, #tpu.memory_space<vmem>>, %arg13: memref<2x128xf32, #tpu.memory_space<vmem>>) attributes {dimension_semantics = [], scalar_prefetch = 0 : i64, scratch_operands = 0 : i64, tpu.core_type = #tpu.core_type<tc>} {
    %c0 = arith.constant 0 : index
    %c0_0 = arith.constant 0 : index
    %0 = vector.load %arg0[%c0, %c0_0] : memref<24x24xf32, #tpu.memory_space<vmem>>, vector<24x24xf32>
    %c0_1 = arith.constant 0 : index
    %c0_2 = arith.constant 0 : index
    %1 = vector.load %arg1[%c0_1, %c0_2] : memref<24x128xf32, #tpu.memory_space<vmem>>, vector<24x128xf32>
    %c0_3 = arith.constant 0 : index
    %c0_4 = arith.constant 0 : index
    %2 = vector.load %arg2[%c0_3, %c0_4] : memref<2x24xf32, #tpu.memory_space<vmem>>, vector<2x24xf32>
    %3 = tpu.iota {dimensions = array<i32: 0>} : vector<24x24xi32>
    %4 = tpu.iota {dimensions = array<i32: 1>} : vector<24x24xi32>
    %5 = arith.cmpi eq, %3, %4 : vector<24x24xi32>
    %6 = arith.extui %5 : vector<24x24xi1> to vector<24x24xi32>
    %7 = arith.sitofp %6 : vector<24x24xi32> to vector<24x24xf32>
    %8 = vector.extract_strided_slice %2 {offsets = [0, 0], sizes = [1, 24], strides = [1, 1]} : vector<2x24xf32> to vector<1x24xf32>
    %9 = vector.broadcast %8 : vector<1x24xf32> to vector<24x24xf32>
    %10 = arith.mulf %7, %9 : vector<24x24xf32>
    %cst = arith.constant dense<0.000000e+00> : vector<24xf32>
    %11 = vector.multi_reduction <add>, %10, %cst [1] : vector<24x24xf32> to vector<24xf32>
    %12 = vector.shape_cast %11 : vector<24xf32> to vector<24x1xf32>
    %13 = vector.extract_strided_slice %2 {offsets = [1, 0], sizes = [1, 24], strides = [1, 1]} : vector<2x24xf32> to vector<1x24xf32>
    %14 = vector.broadcast %13 : vector<1x24xf32> to vector<24x24xf32>
    %15 = arith.mulf %7, %14 : vector<24x24xf32>
    %cst_5 = arith.constant dense<0.000000e+00> : vector<24xf32>
    %16 = vector.multi_reduction <add>, %15, %cst_5 [1] : vector<24x24xf32> to vector<24xf32>
    %17 = vector.shape_cast %16 : vector<24xf32> to vector<24x1xf32>
    %18 = vector.extract_strided_slice %2 {offsets = [0, 0], sizes = [1, 24], strides = [1, 1]} : vector<2x24xf32> to vector<1x24xf32>
    %19 = vector.broadcast %12 : vector<24x1xf32> to vector<24x24xf32>
    %20 = vector.broadcast %18 : vector<1x24xf32> to vector<24x24xf32>
    %21 = arith.mulf %19, %20 : vector<24x24xf32>
    %22 = vector.extract_strided_slice %2 {offsets = [1, 0], sizes = [1, 24], strides = [1, 1]} : vector<2x24xf32> to vector<1x24xf32>
    %23 = vector.broadcast %17 : vector<24x1xf32> to vector<24x24xf32>
    %24 = vector.broadcast %22 : vector<1x24xf32> to vector<24x24xf32>
    %25 = arith.mulf %23, %24 : vector<24x24xf32>
    %26 = arith.addf %21, %25 : vector<24x24xf32>
    %cst_6 = arith.constant 1.000000e+00 : f32
    %27 = vector.broadcast %cst_6 : f32 to vector<24x1xf32>
    %cst_7 = arith.constant 1.000000e+00 : f32
    %28 = vector.broadcast %cst_7 : f32 to vector<1x24xf32>
    %cst_8 = arith.constant 0.000000e+00 : f32
    %29 = vector.broadcast %cst_8 : f32 to vector<2x128xf32>
    %cst_9 = arith.constant 0.000000e+00 : f32
    %30 = vector.broadcast %cst_9 : f32 to vector<2x128xf32>
    %cst_10 = arith.constant dense<0.000000e+00> : vector<24x128xf32>
    %31 = tpu.matmul %0, %1, %cst_10 {dimension_numbers = #tpu.dot_dimension_numbers<[1], [0], [0], [1], [0, 0, 1, 1], [], []>} : vector<24x24xf32>, vector<24x128xf32>, vector<24x128xf32> -> vector<24x128xf32>
    %c0_11 = arith.constant 0 : index
    %c0_12 = arith.constant 0 : index
    %c0_13 = arith.constant 0 : index
    %32 = vector.load %arg3[%c0_11, %c0_12, %c0_13] : memref<3x128x128xf32, #tpu.memory_space<vmem>>, vector<1x128x128xf32>
    %33 = vector.shape_cast %32 : vector<1x128x128xf32> to vector<128x128xf32>
    %cst_14 = arith.constant dense<0.000000e+00> : vector<24x128xf32>
    %34 = tpu.matmul %31, %33, %cst_14 {dimension_numbers = #tpu.dot_dimension_numbers<[1], [0], [0], [1], [0, 0, 1, 1], [], []>} : vector<24x128xf32>, vector<128x128xf32>, vector<24x128xf32> -> vector<24x128xf32>
    %c0_15 = arith.constant 0 : index
    %c0_16 = arith.constant 0 : index
    %c0_17 = arith.constant 0 : index
    %35 = vector.load %arg4[%c0_15, %c0_16, %c0_17] : memref<3x128x128xf32, #tpu.memory_space<vmem>>, vector<1x128x128xf32>
    %36 = vector.shape_cast %35 : vector<1x128x128xf32> to vector<128x128xf32>
    %cst_18 = arith.constant dense<0.000000e+00> : vector<24x128xf32>
    %37 = tpu.matmul %1, %36, %cst_18 {dimension_numbers = #tpu.dot_dimension_numbers<[1], [0], [0], [1], [0, 0, 1, 1], [], []>} : vector<24x128xf32>, vector<128x128xf32>, vector<24x128xf32> -> vector<24x128xf32>
    %38 = arith.addf %34, %37 : vector<24x128xf32>
    %c0_19 = arith.constant 0 : index
    %c0_20 = arith.constant 0 : index
    %c0_21 = arith.constant 0 : index
    %39 = vector.load %arg5[%c0_19, %c0_20, %c0_21] : memref<3x1x128xf32, #tpu.memory_space<vmem>>, vector<1x1x128xf32>
    %40 = vector.shape_cast %39 : vector<1x1x128xf32> to vector<1x128xf32>
    %41 = vector.broadcast %40 : vector<1x128xf32> to vector<24x128xf32>
    %42 = arith.addf %38, %41 : vector<24x128xf32>
    %cst_22 = arith.constant 0.000000e+00 : f32
    %43 = vector.broadcast %cst_22 : f32 to vector<24x128xf32>
    %44 = arith.maximumf %42, %43 : vector<24x128xf32>
    %c0_23 = arith.constant 0 : index
    %c0_24 = arith.constant 0 : index
    %c0_25 = arith.constant 0 : index
    %45 = vector.load %arg6[%c0_23, %c0_24, %c0_25] : memref<3x1x128xf32, #tpu.memory_space<vmem>>, vector<1x1x128xf32>
    %46 = vector.shape_cast %45 : vector<1x1x128xf32> to vector<1x128xf32>
    %47 = vector.broadcast %46 : vector<1x128xf32> to vector<24x128xf32>
    %48 = arith.mulf %44, %47 : vector<24x128xf32>
    %cst_26 = arith.constant dense<0.000000e+00> : vector<24xf32>
    %49 = vector.multi_reduction <add>, %48, %cst_26 [1] : vector<24x128xf32> to vector<24xf32>
    %50 = vector.shape_cast %49 : vector<24xf32> to vector<24x1xf32>
    %51 = math.tanh %50 : vector<24x1xf32>
    %52 = vector.broadcast %51 : vector<24x1xf32> to vector<24x24xf32>
    %53 = arith.mulf %7, %52 : vector<24x24xf32>
    %cst_27 = arith.constant dense<0.000000e+00> : vector<24xf32>
    %54 = vector.multi_reduction <add>, %53, %cst_27 [0] : vector<24x24xf32> to vector<24xf32>
    %55 = vector.shape_cast %54 : vector<24xf32> to vector<1x24xf32>
    %56 = vector.broadcast %55 : vector<1x24xf32> to vector<24x24xf32>
    %57 = vector.broadcast %51 : vector<24x1xf32> to vector<24x24xf32>
    %58 = arith.cmpf ogt, %56, %57 : vector<24x24xf32>
    %59 = vector.broadcast %55 : vector<1x24xf32> to vector<24x24xf32>
    %60 = vector.broadcast %51 : vector<24x1xf32> to vector<24x24xf32>
    %61 = arith.cmpf oeq, %59, %60 : vector<24x24xf32>
    %62 = arith.cmpi slt, %4, %3 : vector<24x24xi32>
    %63 = arith.andi %61, %62 : vector<24x24xi1>
    %64 = arith.ori %58, %63 : vector<24x24xi1>
    %65 = arith.extui %64 : vector<24x24xi1> to vector<24x24xi32>
    %66 = arith.sitofp %65 : vector<24x24xi32> to vector<24x24xf32>
    %67 = vector.broadcast %51 : vector<24x1xf32> to vector<24x24xf32>
    %68 = vector.broadcast %55 : vector<1x24xf32> to vector<24x24xf32>
    %69 = arith.cmpf ogt, %67, %68 : vector<24x24xf32>
    %70 = vector.broadcast %51 : vector<24x1xf32> to vector<24x24xf32>
    %71 = vector.broadcast %55 : vector<1x24xf32> to vector<24x24xf32>
    %72 = arith.cmpf oeq, %70, %71 : vector<24x24xf32>
    %73 = arith.cmpi slt, %3, %4 : vector<24x24xi32>
    %74 = arith.andi %72, %73 : vector<24x24xi1>
    %75 = arith.ori %69, %74 : vector<24x24xi1>
    %76 = arith.extui %75 : vector<24x24xi1> to vector<24x24xi32>
    %77 = arith.sitofp %76 : vector<24x24xi32> to vector<24x24xf32>
    %78 = vector.broadcast %28 : vector<1x24xf32> to vector<24x24xf32>
    %79 = arith.mulf %26, %78 : vector<24x24xf32>
    %80 = arith.mulf %79, %66 : vector<24x24xf32>
    %cst_28 = arith.constant dense<0.000000e+00> : vector<24xf32>
    %81 = vector.multi_reduction <add>, %80, %cst_28 [1] : vector<24x24xf32> to vector<24xf32>
    %82 = vector.shape_cast %81 : vector<24xf32> to vector<24x1xf32>
    %83 = vector.broadcast %27 : vector<24x1xf32> to vector<24x24xf32>
    %84 = arith.mulf %26, %83 : vector<24x24xf32>
    %85 = arith.mulf %84, %77 : vector<24x24xf32>
    %cst_29 = arith.constant dense<0.000000e+00> : vector<24xf32>
    %86 = vector.multi_reduction <add>, %85, %cst_29 [0] : vector<24x24xf32> to vector<24xf32>
    %87 = vector.shape_cast %86 : vector<24xf32> to vector<1x24xf32>
    %cst_30 = arith.constant 1.000000e+01 : f32
    %88 = vector.broadcast %cst_30 : f32 to vector<24x1xf32>
    %89 = arith.mulf %88, %12 : vector<24x1xf32>
    %cst_31 = arith.constant 0.000000e+00 : f32
    %90 = vector.broadcast %cst_31 : f32 to vector<24x1xf32>
    %91 = arith.addf %90, %89 : vector<24x1xf32>
    %cst_32 = arith.constant 1.000000e+01 : f32
    %92 = vector.broadcast %cst_32 : f32 to vector<24x1xf32>
    %93 = arith.mulf %92, %17 : vector<24x1xf32>
    %94 = arith.addf %91, %93 : vector<24x1xf32>
    %95 = vector.extract_strided_slice %2 {offsets = [0, 0], sizes = [1, 24], strides = [1, 1]} : vector<2x24xf32> to vector<1x24xf32>
    %cst_33 = arith.constant 1.000000e+01 : f32
    %96 = vector.broadcast %cst_33 : f32 to vector<1x24xf32>
    %97 = arith.mulf %96, %95 : vector<1x24xf32>
    %cst_34 = arith.constant 0.000000e+00 : f32
    %98 = vector.broadcast %cst_34 : f32 to vector<1x24xf32>
    %99 = arith.addf %98, %97 : vector<1x24xf32>
    %100 = vector.extract_strided_slice %2 {offsets = [1, 0], sizes = [1, 24], strides = [1, 1]} : vector<2x24xf32> to vector<1x24xf32>
    %cst_35 = arith.constant 1.000000e+01 : f32
    %101 = vector.broadcast %cst_35 : f32 to vector<1x24xf32>
    %102 = arith.mulf %101, %100 : vector<1x24xf32>
    %103 = arith.addf %99, %102 : vector<1x24xf32>
    %104 = arith.cmpf olt, %82, %94 : vector<24x1xf32>
    %105 = arith.extui %104 : vector<24x1xi1> to vector<24x1xi32>
    %106 = arith.sitofp %105 : vector<24x1xi32> to vector<24x1xf32>
    %107 = arith.mulf %27, %106 : vector<24x1xf32>
    %108 = arith.cmpf olt, %87, %103 : vector<1x24xf32>
    %109 = arith.extui %108 : vector<1x24xi1> to vector<1x24xi32>
    %110 = arith.sitofp %109 : vector<1x24xi32> to vector<1x24xf32>
    %111 = arith.mulf %28, %110 : vector<1x24xf32>
    %112 = vector.broadcast %51 : vector<24x1xf32> to vector<24x128xf32>
    %113 = arith.mulf %44, %112 : vector<24x128xf32>
    %114 = vector.broadcast %107 : vector<24x1xf32> to vector<24x128xf32>
    %115 = arith.mulf %113, %114 : vector<24x128xf32>
    %116 = vector.extract_strided_slice %2 {offsets = [0, 0], sizes = [1, 24], strides = [1, 1]} : vector<2x24xf32> to vector<1x24xf32>
    %cst_36 = arith.constant 1.000000e-01 : f32
    %117 = vector.broadcast %cst_36 : f32 to vector<1x24xf32>
    %118 = arith.mulf %117, %116 : vector<1x24xf32>
    %cst_37 = arith.constant 0.000000e+00 : f32
    %119 = vector.broadcast %cst_37 : f32 to vector<1x24xf32>
    %120 = arith.addf %119, %118 : vector<1x24xf32>
    %121 = vector.extract_strided_slice %2 {offsets = [1, 0], sizes = [1, 24], strides = [1, 1]} : vector<2x24xf32> to vector<1x24xf32>
    %cst_38 = arith.constant 1.000000e-01 : f32
    %122 = vector.broadcast %cst_38 : f32 to vector<1x24xf32>
    %123 = arith.mulf %122, %121 : vector<1x24xf32>
    %124 = arith.addf %120, %123 : vector<1x24xf32>
    %125 = arith.mulf %111, %124 : vector<1x24xf32>
    %126 = vector.broadcast %125 : vector<1x24xf32> to vector<2x24xf32>
    %127 = arith.mulf %2, %126 : vector<2x24xf32>
    %cst_39 = arith.constant dense<0.000000e+00> : vector<2x128xf32>
    %128 = tpu.matmul %127, %115, %cst_39 {dimension_numbers = #tpu.dot_dimension_numbers<[1], [0], [0], [1], [0, 0, 1, 1], [], []>} : vector<2x24xf32>, vector<24x128xf32>, vector<2x128xf32> -> vector<2x128xf32>
    %129 = arith.addf %30, %128 : vector<2x128xf32>
    %130 = arith.mulf %12, %107 : vector<24x1xf32>
    %cst_40 = arith.constant 0.000000e+00 : f32
    %131 = vector.broadcast %cst_40 : f32 to vector<24x1xf32>
    %132 = arith.cmpf ogt, %130, %131 : vector<24x1xf32>
    %cst_41 = arith.constant -1.000000e+30 : f32
    %133 = vector.shape_cast %132 : vector<24x1xi1> to vector<24x1xi1>
    %134 = vector.broadcast %133 : vector<24x1xi1> to vector<24x128xi1>
    %135 = vector.broadcast %cst_41 : f32 to vector<24x128xf32>
    %136 = arith.select %134, %115, %135 : vector<24x128xi1>, vector<24x128xf32>
    %cst_42 = arith.constant dense<0xFF800000> : vector<128xf32>
    %137 = vector.multi_reduction <maximumf>, %136, %cst_42 [0] : vector<24x128xf32> to vector<128xf32>
    %138 = vector.shape_cast %137 : vector<128xf32> to vector<1x128xf32>
    %139 = arith.mulf %17, %107 : vector<24x1xf32>
    %cst_43 = arith.constant 0.000000e+00 : f32
    %140 = vector.broadcast %cst_43 : f32 to vector<24x1xf32>
    %141 = arith.cmpf ogt, %139, %140 : vector<24x1xf32>
    %cst_44 = arith.constant -1.000000e+30 : f32
    %142 = vector.shape_cast %141 : vector<24x1xi1> to vector<24x1xi1>
    %143 = vector.broadcast %142 : vector<24x1xi1> to vector<24x128xi1>
    %144 = vector.broadcast %cst_44 : f32 to vector<24x128xf32>
    %145 = arith.select %143, %115, %144 : vector<24x128xi1>, vector<24x128xf32>
    %cst_45 = arith.constant dense<0xFF800000> : vector<128xf32>
    %146 = vector.multi_reduction <maximumf>, %145, %cst_45 [0] : vector<24x128xf32> to vector<128xf32>
    %147 = vector.shape_cast %146 : vector<128xf32> to vector<1x128xf32>
    %148 = tpu.concatenate %138, %147 in 0 : vector<1x128xf32>, vector<1x128xf32> -> vector<2x128xf32>
    %149 = arith.addf %29, %148 : vector<2x128xf32>
    %cst_46 = arith.constant dense<0.000000e+00> : vector<24x128xf32>
    %150 = tpu.matmul %0, %115, %cst_46 {dimension_numbers = #tpu.dot_dimension_numbers<[1], [0], [0], [1], [0, 0, 1, 1], [], []>} : vector<24x24xf32>, vector<24x128xf32>, vector<24x128xf32> -> vector<24x128xf32>
    %c1 = arith.constant 1 : index
    %c0_47 = arith.constant 0 : index
    %c0_48 = arith.constant 0 : index
    %151 = vector.load %arg3[%c1, %c0_47, %c0_48] : memref<3x128x128xf32, #tpu.memory_space<vmem>>, vector<1x128x128xf32>
    %152 = vector.shape_cast %151 : vector<1x128x128xf32> to vector<128x128xf32>
    %cst_49 = arith.constant dense<0.000000e+00> : vector<24x128xf32>
    %153 = tpu.matmul %150, %152, %cst_49 {dimension_numbers = #tpu.dot_dimension_numbers<[1], [0], [0], [1], [0, 0, 1, 1], [], []>} : vector<24x128xf32>, vector<128x128xf32>, vector<24x128xf32> -> vector<24x128xf32>
    %c1_50 = arith.constant 1 : index
    %c0_51 = arith.constant 0 : index
    %c0_52 = arith.constant 0 : index
    %154 = vector.load %arg4[%c1_50, %c0_51, %c0_52] : memref<3x128x128xf32, #tpu.memory_space<vmem>>, vector<1x128x128xf32>
    %155 = vector.shape_cast %154 : vector<1x128x128xf32> to vector<128x128xf32>
    %cst_53 = arith.constant dense<0.000000e+00> : vector<24x128xf32>
    %156 = tpu.matmul %115, %155, %cst_53 {dimension_numbers = #tpu.dot_dimension_numbers<[1], [0], [0], [1], [0, 0, 1, 1], [], []>} : vector<24x128xf32>, vector<128x128xf32>, vector<24x128xf32> -> vector<24x128xf32>
    %157 = arith.addf %153, %156 : vector<24x128xf32>
    %c1_54 = arith.constant 1 : index
    %c0_55 = arith.constant 0 : index
    %c0_56 = arith.constant 0 : index
    %158 = vector.load %arg5[%c1_54, %c0_55, %c0_56] : memref<3x1x128xf32, #tpu.memory_space<vmem>>, vector<1x1x128xf32>
    %159 = vector.shape_cast %158 : vector<1x1x128xf32> to vector<1x128xf32>
    %160 = vector.broadcast %159 : vector<1x128xf32> to vector<24x128xf32>
    %161 = arith.addf %157, %160 : vector<24x128xf32>
    %cst_57 = arith.constant 0.000000e+00 : f32
    %162 = vector.broadcast %cst_57 : f32 to vector<24x128xf32>
    %163 = arith.maximumf %161, %162 : vector<24x128xf32>
    %c1_58 = arith.constant 1 : index
    %c0_59 = arith.constant 0 : index
    %c0_60 = arith.constant 0 : index
    %164 = vector.load %arg6[%c1_58, %c0_59, %c0_60] : memref<3x1x128xf32, #tpu.memory_space<vmem>>, vector<1x1x128xf32>
    %165 = vector.shape_cast %164 : vector<1x1x128xf32> to vector<1x128xf32>
    %166 = vector.broadcast %165 : vector<1x128xf32> to vector<24x128xf32>
    %167 = arith.mulf %163, %166 : vector<24x128xf32>
    %cst_61 = arith.constant dense<0.000000e+00> : vector<24xf32>
    %168 = vector.multi_reduction <add>, %167, %cst_61 [1] : vector<24x128xf32> to vector<24xf32>
    %169 = vector.shape_cast %168 : vector<24xf32> to vector<24x1xf32>
    %170 = math.tanh %169 : vector<24x1xf32>
    %171 = vector.broadcast %170 : vector<24x1xf32> to vector<24x24xf32>
    %172 = arith.mulf %7, %171 : vector<24x24xf32>
    %cst_62 = arith.constant dense<0.000000e+00> : vector<24xf32>
    %173 = vector.multi_reduction <add>, %172, %cst_62 [0] : vector<24x24xf32> to vector<24xf32>
    %174 = vector.shape_cast %173 : vector<24xf32> to vector<1x24xf32>
    %175 = vector.broadcast %174 : vector<1x24xf32> to vector<24x24xf32>
    %176 = vector.broadcast %170 : vector<24x1xf32> to vector<24x24xf32>
    %177 = arith.cmpf ogt, %175, %176 : vector<24x24xf32>
    %178 = vector.broadcast %174 : vector<1x24xf32> to vector<24x24xf32>
    %179 = vector.broadcast %170 : vector<24x1xf32> to vector<24x24xf32>
    %180 = arith.cmpf oeq, %178, %179 : vector<24x24xf32>
    %181 = arith.cmpi slt, %4, %3 : vector<24x24xi32>
    %182 = arith.andi %180, %181 : vector<24x24xi1>
    %183 = arith.ori %177, %182 : vector<24x24xi1>
    %184 = arith.extui %183 : vector<24x24xi1> to vector<24x24xi32>
    %185 = arith.sitofp %184 : vector<24x24xi32> to vector<24x24xf32>
    %186 = vector.broadcast %170 : vector<24x1xf32> to vector<24x24xf32>
    %187 = vector.broadcast %174 : vector<1x24xf32> to vector<24x24xf32>
    %188 = arith.cmpf ogt, %186, %187 : vector<24x24xf32>
    %189 = vector.broadcast %170 : vector<24x1xf32> to vector<24x24xf32>
    %190 = vector.broadcast %174 : vector<1x24xf32> to vector<24x24xf32>
    %191 = arith.cmpf oeq, %189, %190 : vector<24x24xf32>
    %192 = arith.cmpi slt, %3, %4 : vector<24x24xi32>
    %193 = arith.andi %191, %192 : vector<24x24xi1>
    %194 = arith.ori %188, %193 : vector<24x24xi1>
    %195 = arith.extui %194 : vector<24x24xi1> to vector<24x24xi32>
    %196 = arith.sitofp %195 : vector<24x24xi32> to vector<24x24xf32>
    %197 = vector.broadcast %111 : vector<1x24xf32> to vector<24x24xf32>
    %198 = arith.mulf %26, %197 : vector<24x24xf32>
    %199 = arith.mulf %198, %185 : vector<24x24xf32>
    %cst_63 = arith.constant dense<0.000000e+00> : vector<24xf32>
    %200 = vector.multi_reduction <add>, %199, %cst_63 [1] : vector<24x24xf32> to vector<24xf32>
    %201 = vector.shape_cast %200 : vector<24xf32> to vector<24x1xf32>
    %202 = vector.broadcast %107 : vector<24x1xf32> to vector<24x24xf32>
    %203 = arith.mulf %26, %202 : vector<24x24xf32>
    %204 = arith.mulf %203, %196 : vector<24x24xf32>
    %cst_64 = arith.constant dense<0.000000e+00> : vector<24xf32>
    %205 = vector.multi_reduction <add>, %204, %cst_64 [0] : vector<24x24xf32> to vector<24xf32>
    %206 = vector.shape_cast %205 : vector<24xf32> to vector<1x24xf32>
    %cst_65 = arith.constant 8.000000e+00 : f32
    %207 = vector.broadcast %cst_65 : f32 to vector<24x1xf32>
    %208 = arith.mulf %207, %12 : vector<24x1xf32>
    %cst_66 = arith.constant 0.000000e+00 : f32
    %209 = vector.broadcast %cst_66 : f32 to vector<24x1xf32>
    %210 = arith.addf %209, %208 : vector<24x1xf32>
    %cst_67 = arith.constant 8.000000e+00 : f32
    %211 = vector.broadcast %cst_67 : f32 to vector<24x1xf32>
    %212 = arith.mulf %211, %17 : vector<24x1xf32>
    %213 = arith.addf %210, %212 : vector<24x1xf32>
    %214 = vector.extract_strided_slice %2 {offsets = [0, 0], sizes = [1, 24], strides = [1, 1]} : vector<2x24xf32> to vector<1x24xf32>
    %cst_68 = arith.constant 8.000000e+00 : f32
    %215 = vector.broadcast %cst_68 : f32 to vector<1x24xf32>
    %216 = arith.mulf %215, %214 : vector<1x24xf32>
    %cst_69 = arith.constant 0.000000e+00 : f32
    %217 = vector.broadcast %cst_69 : f32 to vector<1x24xf32>
    %218 = arith.addf %217, %216 : vector<1x24xf32>
    %219 = vector.extract_strided_slice %2 {offsets = [1, 0], sizes = [1, 24], strides = [1, 1]} : vector<2x24xf32> to vector<1x24xf32>
    %cst_70 = arith.constant 8.000000e+00 : f32
    %220 = vector.broadcast %cst_70 : f32 to vector<1x24xf32>
    %221 = arith.mulf %220, %219 : vector<1x24xf32>
    %222 = arith.addf %218, %221 : vector<1x24xf32>
    %223 = arith.cmpf olt, %201, %213 : vector<24x1xf32>
    %224 = arith.extui %223 : vector<24x1xi1> to vector<24x1xi32>
    %225 = arith.sitofp %224 : vector<24x1xi32> to vector<24x1xf32>
    %226 = arith.mulf %107, %225 : vector<24x1xf32>
    %227 = arith.cmpf olt, %206, %222 : vector<1x24xf32>
    %228 = arith.extui %227 : vector<1x24xi1> to vector<1x24xi32>
    %229 = arith.sitofp %228 : vector<1x24xi32> to vector<1x24xf32>
    %230 = arith.mulf %111, %229 : vector<1x24xf32>
    %231 = vector.broadcast %170 : vector<24x1xf32> to vector<24x128xf32>
    %232 = arith.mulf %163, %231 : vector<24x128xf32>
    %233 = vector.broadcast %226 : vector<24x1xf32> to vector<24x128xf32>
    %234 = arith.mulf %232, %233 : vector<24x128xf32>
    %235 = vector.extract_strided_slice %2 {offsets = [0, 0], sizes = [1, 24], strides = [1, 1]} : vector<2x24xf32> to vector<1x24xf32>
    %cst_71 = arith.constant 1.250000e-01 : f32
    %236 = vector.broadcast %cst_71 : f32 to vector<1x24xf32>
    %237 = arith.mulf %236, %235 : vector<1x24xf32>
    %cst_72 = arith.constant 0.000000e+00 : f32
    %238 = vector.broadcast %cst_72 : f32 to vector<1x24xf32>
    %239 = arith.addf %238, %237 : vector<1x24xf32>
    %240 = vector.extract_strided_slice %2 {offsets = [1, 0], sizes = [1, 24], strides = [1, 1]} : vector<2x24xf32> to vector<1x24xf32>
    %cst_73 = arith.constant 1.250000e-01 : f32
    %241 = vector.broadcast %cst_73 : f32 to vector<1x24xf32>
    %242 = arith.mulf %241, %240 : vector<1x24xf32>
    %243 = arith.addf %239, %242 : vector<1x24xf32>
    %244 = arith.mulf %230, %243 : vector<1x24xf32>
    %245 = vector.broadcast %244 : vector<1x24xf32> to vector<2x24xf32>
    %246 = arith.mulf %2, %245 : vector<2x24xf32>
    %cst_74 = arith.constant dense<0.000000e+00> : vector<2x128xf32>
    %247 = tpu.matmul %246, %234, %cst_74 {dimension_numbers = #tpu.dot_dimension_numbers<[1], [0], [0], [1], [0, 0, 1, 1], [], []>} : vector<2x24xf32>, vector<24x128xf32>, vector<2x128xf32> -> vector<2x128xf32>
    %248 = arith.addf %129, %247 : vector<2x128xf32>
    %249 = arith.mulf %12, %226 : vector<24x1xf32>
    %cst_75 = arith.constant 0.000000e+00 : f32
    %250 = vector.broadcast %cst_75 : f32 to vector<24x1xf32>
    %251 = arith.cmpf ogt, %249, %250 : vector<24x1xf32>
    %cst_76 = arith.constant -1.000000e+30 : f32
    %252 = vector.shape_cast %251 : vector<24x1xi1> to vector<24x1xi1>
    %253 = vector.broadcast %252 : vector<24x1xi1> to vector<24x128xi1>
    %254 = vector.broadcast %cst_76 : f32 to vector<24x128xf32>
    %255 = arith.select %253, %234, %254 : vector<24x128xi1>, vector<24x128xf32>
    %cst_77 = arith.constant dense<0xFF800000> : vector<128xf32>
    %256 = vector.multi_reduction <maximumf>, %255, %cst_77 [0] : vector<24x128xf32> to vector<128xf32>
    %257 = vector.shape_cast %256 : vector<128xf32> to vector<1x128xf32>
    %258 = arith.mulf %17, %226 : vector<24x1xf32>
    %cst_78 = arith.constant 0.000000e+00 : f32
    %259 = vector.broadcast %cst_78 : f32 to vector<24x1xf32>
    %260 = arith.cmpf ogt, %258, %259 : vector<24x1xf32>
    %cst_79 = arith.constant -1.000000e+30 : f32
    %261 = vector.shape_cast %260 : vector<24x1xi1> to vector<24x1xi1>
    %262 = vector.broadcast %261 : vector<24x1xi1> to vector<24x128xi1>
    %263 = vector.broadcast %cst_79 : f32 to vector<24x128xf32>
    %264 = arith.select %262, %234, %263 : vector<24x128xi1>, vector<24x128xf32>
    %cst_80 = arith.constant dense<0xFF800000> : vector<128xf32>
    %265 = vector.multi_reduction <maximumf>, %264, %cst_80 [0] : vector<24x128xf32> to vector<128xf32>
    %266 = vector.shape_cast %265 : vector<128xf32> to vector<1x128xf32>
    %267 = tpu.concatenate %257, %266 in 0 : vector<1x128xf32>, vector<1x128xf32> -> vector<2x128xf32>
    %268 = arith.addf %149, %267 : vector<2x128xf32>
    %cst_81 = arith.constant dense<0.000000e+00> : vector<24x128xf32>
    %269 = tpu.matmul %0, %234, %cst_81 {dimension_numbers = #tpu.dot_dimension_numbers<[1], [0], [0], [1], [0, 0, 1, 1], [], []>} : vector<24x24xf32>, vector<24x128xf32>, vector<24x128xf32> -> vector<24x128xf32>
    %c2 = arith.constant 2 : index
    %c0_82 = arith.constant 0 : index
    %c0_83 = arith.constant 0 : index
    %270 = vector.load %arg3[%c2, %c0_82, %c0_83] : memref<3x128x128xf32, #tpu.memory_space<vmem>>, vector<1x128x128xf32>
    %271 = vector.shape_cast %270 : vector<1x128x128xf32> to vector<128x128xf32>
    %cst_84 = arith.constant dense<0.000000e+00> : vector<24x128xf32>
    %272 = tpu.matmul %269, %271, %cst_84 {dimension_numbers = #tpu.dot_dimension_numbers<[1], [0], [0], [1], [0, 0, 1, 1], [], []>} : vector<24x128xf32>, vector<128x128xf32>, vector<24x128xf32> -> vector<24x128xf32>
    %c2_85 = arith.constant 2 : index
    %c0_86 = arith.constant 0 : index
    %c0_87 = arith.constant 0 : index
    %273 = vector.load %arg4[%c2_85, %c0_86, %c0_87] : memref<3x128x128xf32, #tpu.memory_space<vmem>>, vector<1x128x128xf32>
    %274 = vector.shape_cast %273 : vector<1x128x128xf32> to vector<128x128xf32>
    %cst_88 = arith.constant dense<0.000000e+00> : vector<24x128xf32>
    %275 = tpu.matmul %234, %274, %cst_88 {dimension_numbers = #tpu.dot_dimension_numbers<[1], [0], [0], [1], [0, 0, 1, 1], [], []>} : vector<24x128xf32>, vector<128x128xf32>, vector<24x128xf32> -> vector<24x128xf32>
    %276 = arith.addf %272, %275 : vector<24x128xf32>
    %c2_89 = arith.constant 2 : index
    %c0_90 = arith.constant 0 : index
    %c0_91 = arith.constant 0 : index
    %277 = vector.load %arg5[%c2_89, %c0_90, %c0_91] : memref<3x1x128xf32, #tpu.memory_space<vmem>>, vector<1x1x128xf32>
    %278 = vector.shape_cast %277 : vector<1x1x128xf32> to vector<1x128xf32>
    %279 = vector.broadcast %278 : vector<1x128xf32> to vector<24x128xf32>
    %280 = arith.addf %276, %279 : vector<24x128xf32>
    %cst_92 = arith.constant 0.000000e+00 : f32
    %281 = vector.broadcast %cst_92 : f32 to vector<24x128xf32>
    %282 = arith.maximumf %280, %281 : vector<24x128xf32>
    %c2_93 = arith.constant 2 : index
    %c0_94 = arith.constant 0 : index
    %c0_95 = arith.constant 0 : index
    %283 = vector.load %arg6[%c2_93, %c0_94, %c0_95] : memref<3x1x128xf32, #tpu.memory_space<vmem>>, vector<1x1x128xf32>
    %284 = vector.shape_cast %283 : vector<1x1x128xf32> to vector<1x128xf32>
    %285 = vector.broadcast %284 : vector<1x128xf32> to vector<24x128xf32>
    %286 = arith.mulf %282, %285 : vector<24x128xf32>
    %cst_96 = arith.constant dense<0.000000e+00> : vector<24xf32>
    %287 = vector.multi_reduction <add>, %286, %cst_96 [1] : vector<24x128xf32> to vector<24xf32>
    %288 = vector.shape_cast %287 : vector<24xf32> to vector<24x1xf32>
    %289 = math.tanh %288 : vector<24x1xf32>
    %290 = vector.broadcast %289 : vector<24x1xf32> to vector<24x24xf32>
    %291 = arith.mulf %7, %290 : vector<24x24xf32>
    %cst_97 = arith.constant dense<0.000000e+00> : vector<24xf32>
    %292 = vector.multi_reduction <add>, %291, %cst_97 [0] : vector<24x24xf32> to vector<24xf32>
    %293 = vector.shape_cast %292 : vector<24xf32> to vector<1x24xf32>
    %294 = vector.broadcast %293 : vector<1x24xf32> to vector<24x24xf32>
    %295 = vector.broadcast %289 : vector<24x1xf32> to vector<24x24xf32>
    %296 = arith.cmpf ogt, %294, %295 : vector<24x24xf32>
    %297 = vector.broadcast %293 : vector<1x24xf32> to vector<24x24xf32>
    %298 = vector.broadcast %289 : vector<24x1xf32> to vector<24x24xf32>
    %299 = arith.cmpf oeq, %297, %298 : vector<24x24xf32>
    %300 = arith.cmpi slt, %4, %3 : vector<24x24xi32>
    %301 = arith.andi %299, %300 : vector<24x24xi1>
    %302 = arith.ori %296, %301 : vector<24x24xi1>
    %303 = arith.extui %302 : vector<24x24xi1> to vector<24x24xi32>
    %304 = arith.sitofp %303 : vector<24x24xi32> to vector<24x24xf32>
    %305 = vector.broadcast %289 : vector<24x1xf32> to vector<24x24xf32>
    %306 = vector.broadcast %293 : vector<1x24xf32> to vector<24x24xf32>
    %307 = arith.cmpf ogt, %305, %306 : vector<24x24xf32>
    %308 = vector.broadcast %289 : vector<24x1xf32> to vector<24x24xf32>
    %309 = vector.broadcast %293 : vector<1x24xf32> to vector<24x24xf32>
    %310 = arith.cmpf oeq, %308, %309 : vector<24x24xf32>
    %311 = arith.cmpi slt, %3, %4 : vector<24x24xi32>
    %312 = arith.andi %310, %311 : vector<24x24xi1>
    %313 = arith.ori %307, %312 : vector<24x24xi1>
    %314 = arith.extui %313 : vector<24x24xi1> to vector<24x24xi32>
    %315 = arith.sitofp %314 : vector<24x24xi32> to vector<24x24xf32>
    %316 = vector.broadcast %230 : vector<1x24xf32> to vector<24x24xf32>
    %317 = arith.mulf %26, %316 : vector<24x24xf32>
    %318 = arith.mulf %317, %304 : vector<24x24xf32>
    %cst_98 = arith.constant dense<0.000000e+00> : vector<24xf32>
    %319 = vector.multi_reduction <add>, %318, %cst_98 [1] : vector<24x24xf32> to vector<24xf32>
    %320 = vector.shape_cast %319 : vector<24xf32> to vector<24x1xf32>
    %321 = vector.broadcast %226 : vector<24x1xf32> to vector<24x24xf32>
    %322 = arith.mulf %26, %321 : vector<24x24xf32>
    %323 = arith.mulf %322, %315 : vector<24x24xf32>
    %cst_99 = arith.constant dense<0.000000e+00> : vector<24xf32>
    %324 = vector.multi_reduction <add>, %323, %cst_99 [0] : vector<24x24xf32> to vector<24xf32>
    %325 = vector.shape_cast %324 : vector<24xf32> to vector<1x24xf32>
    %cst_100 = arith.constant 7.000000e+00 : f32
    %326 = vector.broadcast %cst_100 : f32 to vector<24x1xf32>
    %327 = arith.mulf %326, %12 : vector<24x1xf32>
    %cst_101 = arith.constant 0.000000e+00 : f32
    %328 = vector.broadcast %cst_101 : f32 to vector<24x1xf32>
    %329 = arith.addf %328, %327 : vector<24x1xf32>
    %cst_102 = arith.constant 7.000000e+00 : f32
    %330 = vector.broadcast %cst_102 : f32 to vector<24x1xf32>
    %331 = arith.mulf %330, %17 : vector<24x1xf32>
    %332 = arith.addf %329, %331 : vector<24x1xf32>
    %333 = vector.extract_strided_slice %2 {offsets = [0, 0], sizes = [1, 24], strides = [1, 1]} : vector<2x24xf32> to vector<1x24xf32>
    %cst_103 = arith.constant 7.000000e+00 : f32
    %334 = vector.broadcast %cst_103 : f32 to vector<1x24xf32>
    %335 = arith.mulf %334, %333 : vector<1x24xf32>
    %cst_104 = arith.constant 0.000000e+00 : f32
    %336 = vector.broadcast %cst_104 : f32 to vector<1x24xf32>
    %337 = arith.addf %336, %335 : vector<1x24xf32>
    %338 = vector.extract_strided_slice %2 {offsets = [1, 0], sizes = [1, 24], strides = [1, 1]} : vector<2x24xf32> to vector<1x24xf32>
    %cst_105 = arith.constant 7.000000e+00 : f32
    %339 = vector.broadcast %cst_105 : f32 to vector<1x24xf32>
    %340 = arith.mulf %339, %338 : vector<1x24xf32>
    %341 = arith.addf %337, %340 : vector<1x24xf32>
    %342 = arith.cmpf olt, %320, %332 : vector<24x1xf32>
    %343 = arith.extui %342 : vector<24x1xi1> to vector<24x1xi32>
    %344 = arith.sitofp %343 : vector<24x1xi32> to vector<24x1xf32>
    %345 = arith.mulf %226, %344 : vector<24x1xf32>
    %346 = arith.cmpf olt, %325, %341 : vector<1x24xf32>
    %347 = arith.extui %346 : vector<1x24xi1> to vector<1x24xi32>
    %348 = arith.sitofp %347 : vector<1x24xi32> to vector<1x24xf32>
    %349 = arith.mulf %230, %348 : vector<1x24xf32>
    %350 = vector.broadcast %289 : vector<24x1xf32> to vector<24x128xf32>
    %351 = arith.mulf %282, %350 : vector<24x128xf32>
    %352 = vector.broadcast %345 : vector<24x1xf32> to vector<24x128xf32>
    %353 = arith.mulf %351, %352 : vector<24x128xf32>
    %354 = vector.extract_strided_slice %2 {offsets = [0, 0], sizes = [1, 24], strides = [1, 1]} : vector<2x24xf32> to vector<1x24xf32>
    %cst_106 = arith.constant 0.142857149 : f32
    %355 = vector.broadcast %cst_106 : f32 to vector<1x24xf32>
    %356 = arith.mulf %355, %354 : vector<1x24xf32>
    %cst_107 = arith.constant 0.000000e+00 : f32
    %357 = vector.broadcast %cst_107 : f32 to vector<1x24xf32>
    %358 = arith.addf %357, %356 : vector<1x24xf32>
    %359 = vector.extract_strided_slice %2 {offsets = [1, 0], sizes = [1, 24], strides = [1, 1]} : vector<2x24xf32> to vector<1x24xf32>
    %cst_108 = arith.constant 0.142857149 : f32
    %360 = vector.broadcast %cst_108 : f32 to vector<1x24xf32>
    %361 = arith.mulf %360, %359 : vector<1x24xf32>
    %362 = arith.addf %358, %361 : vector<1x24xf32>
    %363 = arith.mulf %349, %362 : vector<1x24xf32>
    %364 = vector.broadcast %363 : vector<1x24xf32> to vector<2x24xf32>
    %365 = arith.mulf %2, %364 : vector<2x24xf32>
    %cst_109 = arith.constant dense<0.000000e+00> : vector<2x128xf32>
    %366 = tpu.matmul %365, %353, %cst_109 {dimension_numbers = #tpu.dot_dimension_numbers<[1], [0], [0], [1], [0, 0, 1, 1], [], []>} : vector<2x24xf32>, vector<24x128xf32>, vector<2x128xf32> -> vector<2x128xf32>
    %367 = arith.addf %248, %366 : vector<2x128xf32>
    %368 = arith.mulf %12, %345 : vector<24x1xf32>
    %cst_110 = arith.constant 0.000000e+00 : f32
    %369 = vector.broadcast %cst_110 : f32 to vector<24x1xf32>
    %370 = arith.cmpf ogt, %368, %369 : vector<24x1xf32>
    %cst_111 = arith.constant -1.000000e+30 : f32
    %371 = vector.shape_cast %370 : vector<24x1xi1> to vector<24x1xi1>
    %372 = vector.broadcast %371 : vector<24x1xi1> to vector<24x128xi1>
    %373 = vector.broadcast %cst_111 : f32 to vector<24x128xf32>
    %374 = arith.select %372, %353, %373 : vector<24x128xi1>, vector<24x128xf32>
    %cst_112 = arith.constant dense<0xFF800000> : vector<128xf32>
    %375 = vector.multi_reduction <maximumf>, %374, %cst_112 [0] : vector<24x128xf32> to vector<128xf32>
    %376 = vector.shape_cast %375 : vector<128xf32> to vector<1x128xf32>
    %377 = arith.mulf %17, %345 : vector<24x1xf32>
    %cst_113 = arith.constant 0.000000e+00 : f32
    %378 = vector.broadcast %cst_113 : f32 to vector<24x1xf32>
    %379 = arith.cmpf ogt, %377, %378 : vector<24x1xf32>
    %cst_114 = arith.constant -1.000000e+30 : f32
    %380 = vector.shape_cast %379 : vector<24x1xi1> to vector<24x1xi1>
    %381 = vector.broadcast %380 : vector<24x1xi1> to vector<24x128xi1>
    %382 = vector.broadcast %cst_114 : f32 to vector<24x128xf32>
    %383 = arith.select %381, %353, %382 : vector<24x128xi1>, vector<24x128xf32>
    %cst_115 = arith.constant dense<0xFF800000> : vector<128xf32>
    %384 = vector.multi_reduction <maximumf>, %383, %cst_115 [0] : vector<24x128xf32> to vector<128xf32>
    %385 = vector.shape_cast %384 : vector<128xf32> to vector<1x128xf32>
    %386 = tpu.concatenate %376, %385 in 0 : vector<1x128xf32>, vector<1x128xf32> -> vector<2x128xf32>
    %387 = arith.addf %268, %386 : vector<2x128xf32>
    %c0_116 = arith.constant 0 : index
    %c0_117 = arith.constant 0 : index
    %388 = vector.load %arg7[%c0_116, %c0_117] : memref<256x128xf32, #tpu.memory_space<vmem>>, vector<128x128xf32>
    %cst_118 = arith.constant dense<0.000000e+00> : vector<2x128xf32>
    %389 = tpu.matmul %387, %388, %cst_118 {dimension_numbers = #tpu.dot_dimension_numbers<[1], [0], [0], [1], [0, 0, 1, 1], [], []>} : vector<2x128xf32>, vector<128x128xf32>, vector<2x128xf32> -> vector<2x128xf32>
    %c128 = arith.constant 128 : index
    %c0_119 = arith.constant 0 : index
    %390 = vector.load %arg7[%c128, %c0_119] : memref<256x128xf32, #tpu.memory_space<vmem>>, vector<128x128xf32>
    %cst_120 = arith.constant dense<0.000000e+00> : vector<2x128xf32>
    %391 = tpu.matmul %367, %390, %cst_120 {dimension_numbers = #tpu.dot_dimension_numbers<[1], [0], [0], [1], [0, 0, 1, 1], [], []>} : vector<2x128xf32>, vector<128x128xf32>, vector<2x128xf32> -> vector<2x128xf32>
    %392 = arith.addf %389, %391 : vector<2x128xf32>
    %c0_121 = arith.constant 0 : index
    %c0_122 = arith.constant 0 : index
    %393 = vector.load %arg8[%c0_121, %c0_122] : memref<1x128xf32, #tpu.memory_space<vmem>>, vector<1x128xf32>
    %394 = vector.broadcast %393 : vector<1x128xf32> to vector<2x128xf32>
    %395 = arith.addf %392, %394 : vector<2x128xf32>
    %cst_123 = arith.constant 0.000000e+00 : f32
    %396 = vector.broadcast %cst_123 : f32 to vector<2x128xf32>
    %397 = arith.maximumf %395, %396 : vector<2x128xf32>
    %c0_124 = arith.constant 0 : index
    %c0_125 = arith.constant 0 : index
    %398 = vector.load %arg9[%c0_124, %c0_125] : memref<128x64xf32, #tpu.memory_space<vmem>>, vector<128x64xf32>
    %cst_126 = arith.constant dense<0.000000e+00> : vector<2x64xf32>
    %399 = tpu.matmul %397, %398, %cst_126 {dimension_numbers = #tpu.dot_dimension_numbers<[1], [0], [0], [1], [0, 0, 1, 1], [], []>} : vector<2x128xf32>, vector<128x64xf32>, vector<2x64xf32> -> vector<2x64xf32>
    %c0_127 = arith.constant 0 : index
    %c0_128 = arith.constant 0 : index
    %400 = vector.load %arg10[%c0_127, %c0_128] : memref<1x64xf32, #tpu.memory_space<vmem>>, vector<1x64xf32>
    %401 = vector.broadcast %400 : vector<1x64xf32> to vector<2x64xf32>
    %402 = arith.addf %399, %401 : vector<2x64xf32>
    %cst_129 = arith.constant 0.000000e+00 : f32
    %403 = vector.broadcast %cst_129 : f32 to vector<2x64xf32>
    %404 = arith.maximumf %402, %403 : vector<2x64xf32>
    %c0_130 = arith.constant 0 : index
    %c0_131 = arith.constant 0 : index
    %405 = vector.load %arg11[%c0_130, %c0_131] : memref<64x128xf32, #tpu.memory_space<vmem>>, vector<64x128xf32>
    %cst_132 = arith.constant dense<0.000000e+00> : vector<2x128xf32>
    %406 = tpu.matmul %404, %405, %cst_132 {dimension_numbers = #tpu.dot_dimension_numbers<[1], [0], [0], [1], [0, 0, 1, 1], [], []>} : vector<2x64xf32>, vector<64x128xf32>, vector<2x128xf32> -> vector<2x128xf32>
    %c0_133 = arith.constant 0 : index
    %c0_134 = arith.constant 0 : index
    %407 = vector.load %arg12[%c0_133, %c0_134] : memref<1x128xf32, #tpu.memory_space<vmem>>, vector<1x128xf32>
    %408 = vector.broadcast %407 : vector<1x128xf32> to vector<2x128xf32>
    %409 = arith.addf %406, %408 : vector<2x128xf32>
    %cst_135 = arith.constant dense<0xFF800000> : vector<2xf32>
    %410 = vector.multi_reduction <maximumf>, %409, %cst_135 [1] : vector<2x128xf32> to vector<2xf32>
    %411 = vector.shape_cast %410 : vector<2xf32> to vector<2x1xf32>
    %412 = vector.broadcast %411 : vector<2x1xf32> to vector<2x128xf32>
    %413 = arith.subf %409, %412 : vector<2x128xf32>
    %414 = math.exp %413 : vector<2x128xf32>
    %cst_136 = arith.constant dense<0.000000e+00> : vector<2xf32>
    %415 = vector.multi_reduction <add>, %414, %cst_136 [1] : vector<2x128xf32> to vector<2xf32>
    %416 = vector.shape_cast %415 : vector<2xf32> to vector<2x1xf32>
    %417 = math.log %416 : vector<2x1xf32>
    %418 = arith.addf %417, %411 : vector<2x1xf32>
    %419 = vector.broadcast %418 : vector<2x1xf32> to vector<2x128xf32>
    %420 = arith.subf %409, %419 : vector<2x128xf32>
    %c0_137 = arith.constant 0 : index
    %c0_138 = arith.constant 0 : index
    %421 = vector.load %arg13[%c0_137, %c0_138] : memref<2x128xf32, #tpu.memory_space<vmem>>, vector<2x128xf32>
    tpu.vector_store %arg13[%c0_137, %c0_138], %420 {strides = array<i32>} : memref<2x128xf32, #tpu.memory_space<vmem>>, vector<2x128xf32>,
    return
  }
}

</mosaic_0001>

<bundles_post_ra>
// kernel: net_forward.1
= control target key start
LH: loop header
LB: loop body
LE: loop exit
PB: predicated region body
PF: predicated region fallthrough
CT: control target
= control target key end

     0   :  { %18 = vsyncpa [#allocation3], 0  ;;  %s4422_s0 = inlined_call_operand.vmem [shape: f32[24,24], index: 0, kind: input, shape index: {}]   ;;  %s4423_s1 = inlined_call_operand.vmem [shape: f32[24,128], index: 1, kind: input, shape index: {}]   ;;  %s4424_s2 = inlined_call_operand.vmem [shape: f32[2,24], index: 2, kind: input, shape index: {}]   ;;  %s4425_s3 = inlined_call_operand.hbm [shape: f32[3,128,128], index: 3, kind: input, shape index: {}]   ;;  %s4426_s4 = inlined_call_operand.hbm [shape: f32[3,128,128], index: 4, kind: input, shape index: {}]   ;;  %s4427_s5 = inlined_call_operand.vmem [shape: f32[3,1,128], index: 5, kind: input, shape index: {}]   ;;  %s4428_s6 = inlined_call_operand.vmem [shape: f32[3,1,128], index: 6, kind: input, shape index: {}]   ;;  %s4429_s7 = inlined_call_operand.vmem [shape: f32[256,128], index: 7, kind: input, shape index: {}]   ;;  %s4430_s8 = inlined_call_operand.vmem [shape: f32[1,128], index: 8, kind: input, shape index: {}]   ;;  %s4431_s9 = inlined_call_operand.vmem [shape: f32[128,64], index: 9, kind: input, shape index: {}]   ;;  %s4432_s10 = inlined_call_operand.vmem [shape: f32[1,64], index: 10, kind: input, shape index: {}]   ;;  %s4433_s11 = inlined_call_operand.hbm [shape: f32[64,128], index: 11, kind: input, shape index: {}]   ;;  %s4434_s12 = inlined_call_operand.vmem [shape: f32[1,128], index: 12, kind: input, shape index: {}]   ;;  %s4435_s13 = inlined_call_operand.hbm [shape: f32[2,128], index: 13, kind: output, shape index: {}]  }
   0x1   :  { %19 = vsyncpa [#allocation6], 0 }
   0x2   :  { %20 = vsyncpa [#allocation4], 0  ;;  %s3329_s25 = smov [#allocation5]   ;;  %s3330_s27 = smov [#allocation2]  }
   0x3   :  { %s44_s26 = sshll.u32 %s3329_s25, 4  ;;  %s32_s28 = sshll.u32 %s3330_s27, 4  ;;  %s45_s26 = int_to_ptr.vmem [resolvable:$true] %s44_s26  ;;  %s3408_s28 = int_to_ptr.vmem [resolvable:$true] %s32_s28 }
   0x4   :  { %s3235_s14 = scalar_lea.hbm %s4426_s4, 6144 }
   0x5   :  { %p3236_p0 = scmp.ne.s32.totalorder %s4426_s4, %s3235_s14  ;;  %p3239_p1 = scmp.lt.u32.totalorder %s3235_s14, %s4426_s4 }
   0x7   :  { %p3241_p2 = pnand %p3239_p1, %p3236_p0 }
   0x9   :  { %3244 = shalt.err (!%p3241_p2)
}
   0xa   :  { %s3245_s19 = scalar_lea.vmem %s45_s26, 6144  ;;  %p3250_p4 = scmp.lt.s32.totalorder %s45_s26, %s45_s26 }
   0xb   :  { %p3246_p3 = scmp.ne.s32.totalorder %s45_s26, %s3245_s19  ;;  %p3251_p5 = scmp.lt.s32.totalorder %s3245_s19, %s3245_s19 }
   0xd   :  { %p3252_p6 = por %p3251_p5, %p3250_p4 }
   0xf   :  { %p3253_p7 = pnand %p3252_p6, %p3246_p3 }
  0x11   :  { %3256 = shalt.err (!%p3253_p7)
}
  0x12   :  { %s3331_s20 = smov 128   ;;  %s3332_s21 = smov 8  }
  0x13   :  { %50 = dma.hbm_to_vmem [thread:$0]  %s4426_s4, 6144, %s45_s26, [#allocation6], %s3331_s20, %s3331_s20, %s3332_s21  }
  0x14   :  { %s3257_s27 = scalar_lea.hbm %s4425_s3, 6144 }
  0x15   :  { %p3258_p8 = scmp.ne.s32.totalorder %s4425_s3, %s3257_s27  ;;  %p3261_p9 = scmp.lt.u32.totalorder %s3257_s27, %s4425_s3 }
  0x17   :  { %p3263_p10 = pnand %p3261_p9, %p3258_p8 }
  0x19   :  { %3266 = shalt.err (!%p3263_p10)
}
  0x1a   :  { %s3267_s16 = scalar_lea.vmem %s3408_s28, 6144  ;;  %p3272_p12 = scmp.lt.s32.totalorder %s3408_s28, %s3408_s28 }
  0x1b   :  { %p3268_p11 = scmp.ne.s32.totalorder %s3408_s28, %s3267_s16  ;;  %p3273_p13 = scmp.lt.s32.totalorder %s3267_s16, %s3267_s16 }
  0x1d   :  { %p3274_p0 = por %p3273_p13, %p3272_p12 }
  0x1f   :  { %p3275_p1 = pnand %p3274_p0, %p3268_p11 }
  0x21   :  { %3278 = shalt.err (!%p3275_p1)
}
  0x22   :  { %38 = dma.hbm_to_vmem [thread:$0]  %s4425_s3, 6144, %s3408_s28, [#allocation3], %s3331_s20, %s3331_s20, %s3332_s21  }
  0x23   :  { %s3333_s17 = smov [#allocation7]   ;;  %s3279_s23 = scalar_lea.hbm %s4433_s11, 1024 }
  0x24   :  { %s68_s18 = sshll.u32 %s3333_s17, 4  ;;  %p3280_p2 = scmp.ne.s32.totalorder %s4433_s11, %s3279_s23  ;;  %s69_s18 = int_to_ptr.vmem [resolvable:$true] %s68_s18 }
  0x25   :  { %p3283_p3 = scmp.lt.u32.totalorder %s3279_s23, %s4433_s11 }
  0x27   :  { %p3285_p4 = pnand %p3283_p3, %p3280_p2 }
  0x29   :  { %3288 = shalt.err (!%p3285_p4)
}
  0x2a   :  { %s3289_s30 = scalar_lea.vmem %s69_s18, 1024  ;;  %p3294_p6 = scmp.lt.s32.totalorder %s69_s18, %s69_s18 }
  0x2b   :  { %p3290_p5 = scmp.ne.s32.totalorder %s69_s18, %s3289_s30  ;;  %p3295_p7 = scmp.lt.s32.totalorder %s3289_s30, %s3289_s30 }
  0x2d   :  { %p3296_p8 = por %p3295_p7, %p3294_p6 }
  0x2f   :  { %p3297_p9 = pnand %p3296_p8, %p3290_p5 }
  0x31   :  { %3300 = shalt.err (!%p3297_p9)
}
  0x32   :  { %74 = dma.hbm_to_vmem [thread:$0]  %s4433_s11, 1024, %s69_s18, [#allocation6], %s3331_s20, %s3331_s20, %s3332_s21  }
  0x33   :  { %3323 = dma.done.wait [#allocation3], 6144  }
  0x34   :  { %3324 = vsyncadd [#allocation3], 4294961152 }
  0x35   :  { %3325 = dma.done.wait [#allocation6], 7168  }
  0x36   :  { %3326 = vsyncadd [#allocation6], 4294960128  ;;  %v3334_v0 = vmov 0.0|0.0   ;;  %vm4436_vm0 = vmmov 0   ;;  %v3336_v1 = vmov 0.0   ;;  %v3469_v2 = vld [vmem:[%s4423_s1] sm:$0xff] }
  0x37   :  { %2950 = vmatprep.subr.bf16.mxu0 %v3334_v0  ;;  %2514 = vmatprep.mubr.msk.f32.mxu0 %vm4436_vm0, %v3336_v1  ;;  %v3474_v3 = vld [vmem:[%s4423_s1 + $0x8] sm:$0xff]  ;;  %v255_v5 = vld [vmem:[#allocation5] sm:$0xff]  ;;  %v257_v10 = vld [vmem:[#allocation5 + $0x10] sm:$0xff]  ;;  %vm4438_vm1 = vcmask 195584  }
  0x38   :  { %2953 = vmatprep.subr.bf16.mxu1 %v3334_v0  ;;  %2555 = vmatprep.mubr.msk.f32.mxu1 %vm4436_vm0, %v3336_v1  ;;  %v2951_v4 = vpack.c.bf16 %v3474_v3, %v3469_v2  ;;  %v256_v6 = vld [vmem:[#allocation5 + $0x8] sm:$0xff]  ;;  %v239_v7 = vld [vmem:[#allocation2] sm:$0xff]  ;;  %v258_v11 = vld [vmem:[#allocation5 + $0x18] sm:$0xff] }
  0x39   :  { %v2954_v8 = vpack.c.bf16 %v256_v6, %v255_v5  ;;  %v240_v9 = vld [vmem:[#allocation2 + $0x8] sm:$0xff]  ;;  %v3482_v12 = vld [vmem:[%s4423_s1 + $0x10] sm:$0xff]  ;;  %v3487_v13 = vld [vmem:[%s4422_s0] sm:$0xff]  ;;  %v2957_v15 = vpack.c.bf16 %v258_v11, %v257_v10 }
  0x3a   :  { %2952 = vmatpush3.bf16.msra.mxu0 %v2951_v4  ;;  %v2978_v14 = vpack.c.bf16 %v240_v9, %v239_v7  ;;  %v241_v16 = vld [vmem:[#allocation2 + $0x10] sm:$0xff]  ;;  %v242_v17 = vld [vmem:[#allocation2 + $0x18] sm:$0xff]  ;;  %v259_v18 = vld [vmem:[#allocation5 + $0x20] sm:$0xff]  ;;  %v93_v7 = vlaneseq }
  0x3b   :  { %2512 = vmatprep.subr.mxu0 %v3336_v1  ;;  %2955 = vmatpush3.bf16.msra.mxu1 %v2954_v8  ;;  %v260_v19 = vld [vmem:[#allocation5 + $0x28] sm:$0xff]  ;;  %v2981_v21 = vpack.c.bf16 %v242_v17, %v241_v16  ;;  %v243_v23 = vld [vmem:[#allocation2 + $0x20] sm:$0xff]  ;;  %v261_v25 = vld [vmem:[#allocation5 + $0x30] sm:$0xff] }
  0x3c   :  { %2956 = vmatprep.subr.bf16.mxu1 %v3334_v0  ;;  %v3499_v20 = vld [vmem:[%s4422_s0 + $0x8] sm:$0xff]  ;;  %v2960_v22 = vpack.c.bf16 %v260_v19, %v259_v18  ;;  %v262_v26 = vld [vmem:[#allocation5 + $0x38] sm:$0xff]  ;;  %v3510_v27 = vld [vmem:[%s4422_s0 + $0x10] sm:$0xff]  ;;  %v3544_v8 = vshrl.u32 %v93_v7, 7 }
  0x3d   :  { %v244_v24 = vld [vmem:[#allocation2 + $0x28] sm:$0xff]  ;;  %v2963_v29 = vpack.c.bf16 %v262_v26, %v261_v25  ;;  %v245_v30 = vld [vmem:[#allocation2 + $0x30] sm:$0xff]  ;;  %v246_v31 = vld [vmem:[#allocation2 + $0x38] sm:$0xff] }
  0x3e   :  { %2513 = vmatpush3.msra.mxu0 %v3482_v12  ;;  %v2984_v28 = vpack.c.bf16 %v244_v24, %v243_v23  ;;  %v263_v32 = vld [vmem:[#allocation5 + $0x40] sm:$0xff]  ;;  %v264_v33 = vld [vmem:[#allocation5 + $0x48] sm:$0xff]  ;;  %v2987_v34 = vpack.c.bf16 %v246_v31, %v245_v30  ;;  %v265_v38 = vld [vmem:[#allocation5 + $0x50] sm:$0xff]  ;;  %v3550_v11 = vadd.s32 8, %v3544_v8  ;;  %v3555_v16 = vsub.s32 0, %v3544_v8 }
  0x3f   :  { %2515 = vmatmul.mubr.msk.f32.vlgmr.msra.gmra.mrb[0].mxu0 %vm4438_vm1, %v3487_v13  ;;  %2977 = vmatprep.subr.bf16.mxu0 %v3334_v0  ;;  %v2966_v35 = vpack.c.bf16 %v264_v33, %v263_v32  ;;  %v247_v36 = vld [vmem:[#allocation2 + $0x40] sm:$0xff]  ;;  %v248_v37 = vld [vmem:[#allocation2 + $0x48] sm:$0xff]  ;;  %v266_v39 = vld [vmem:[#allocation5 + $0x58] sm:$0xff]  ;;  %v127_v26 = vsub.s32 1, %v3544_v8  ;;  %v3585_v32 = vadd.s32 16, %v3544_v8 }
  0x40   :  { %2517 = vmatprep.mubr.msk.f32.mxu0 %vm4436_vm0, %v3336_v1  ;;  %2979 = vmatpush3.bf16.msra.mxu0 %v2978_v14  ;;  %v2990_v40 = vpack.c.bf16 %v248_v37, %v247_v36  ;;  %v2969_v41 = vpack.c.bf16 %v266_v39, %v265_v38  ;;  %v249_v42 = vld [vmem:[#allocation2 + $0x50] sm:$0xff]  ;;  %v250_v43 = vld [vmem:[#allocation2 + $0x58] sm:$0xff]  ;;  %v267_v44 = vld [vmem:[#allocation5 + $0x60] sm:$0xff] }
  0x41   :  { %2958 = vmatpush3.bf16.msra.mxu1 %v2957_v15  ;;  %2980 = vmatprep.subr.bf16.mxu0 %v3334_v0  ;;  %v268_v45 = vld [vmem:[#allocation5 + $0x68] sm:$0xff]  ;;  %v2993_v46 = vpack.c.bf16 %v250_v43, %v249_v42  ;;  %v251_v48 = vld [vmem:[#allocation2 + $0x60] sm:$0xff]  ;;  %v269_v50 = vld [vmem:[#allocation5 + $0x70] sm:$0xff] }
  0x42   :  { %2959 = vmatprep.subr.bf16.mxu1 %v3334_v0  ;;  %v2972_v47 = vpack.c.bf16 %v268_v45, %v267_v44  ;;  %v252_v49 = vld [vmem:[#allocation2 + $0x68] sm:$0xff]  ;;  %v270_v51 = vld [vmem:[#allocation5 + $0x78] sm:$0xff]  ;;  %v253_v54 = vld [vmem:[#allocation2 + $0x70] sm:$0xff] }
  0x43   :  { %2518 = vmatmul.mubr.msk.f32.gmra.mrb[2].mxu0 %vm4438_vm1, %v3499_v20  ;;  %v2996_v52 = vpack.c.bf16 %v252_v49, %v251_v48  ;;  %v2975_v53 = vpack.c.bf16 %v270_v51, %v269_v50  ;;  %v254_v55 = vld [vmem:[#allocation2 + $0x78] sm:$0xff]  ;;  %v2251_v10 = vld [vmem:[%s4427_s5] ss:$0 sm:$0xff] }
  0x44   :  { %2520 = vmatprep.mubr.msk.f32.mxu0 %vm4436_vm0, %v3336_v1  ;;  %2982 = vmatpush3.bf16.msra.mxu0 %v2981_v21  ;;  %v2999_v56 = vpack.c.bf16 %v254_v55, %v253_v54  ;;  %v3562_v18 = vld [vmem:[%s4424_s2] sm:$0x3] }
  0x45   :  { %2961 = vmatpush3.bf16.msra.mxu1 %v2960_v22  ;;  %2983 = vmatprep.subr.bf16.mxu0 %v3334_v0  ;;  %v2252_v21 = vld [vmem:[%s4428_s6] ss:$0 sm:$0xff]  ;;  %v3572_v25 = vrot.slane %v3562_v18, %v3555_v16  ;;  %v3591_v37 = vrot.slane %v3562_v18, %v127_v26 }
  0x46   :  { %2962 = vmatprep.subr.bf16.mxu1 %v3334_v0  ;;  %v740_v55 = vld [vmem:[#allocation5 + $0x80] sm:$0xff] }
  0x47   :  { %2521 = vmatmul.mubr.msk.f32.gmra.mrb[4].mxu0 %vm4438_vm1, %v3510_v27 }
  0x48   :  { %2985 = vmatpush3.bf16.msra.mxu0 %v2984_v28  ;;  %2596 = vmatprep.mubr.msk.f32.mxu0 %vm4436_vm0, %v3336_v1 }
  0x49   :  { %2964 = vmatpush3.bf16.msra.mxu1 %v2963_v29  ;;  %2986 = vmatprep.subr.bf16.mxu0 %v3334_v0 }
  0x4a   :  { %2965 = vmatprep.subr.bf16.mxu1 %v3334_v0 }
  0x4c   :  { %2988 = vmatpush3.bf16.msra.mxu0 %v2987_v34 }
  0x4d   :  { %2967 = vmatpush3.bf16.msra.mxu1 %v2966_v35  ;;  %2989 = vmatprep.subr.bf16.mxu0 %v3334_v0 }
  0x4e   :  { %2968 = vmatprep.subr.bf16.mxu1 %v3334_v0 }
  0x50   :  { %2991 = vmatpush3.bf16.msra.mxu0 %v2990_v40 }
  0x51   :  { %2970 = vmatpush3.bf16.msra.mxu1 %v2969_v41  ;;  %2992 = vmatprep.subr.bf16.mxu0 %v3334_v0 }
  0x52   :  { %2971 = vmatprep.subr.bf16.mxu1 %v3334_v0 }
  0x54   :  { %2994 = vmatpush3.bf16.msra.mxu0 %v2993_v46 }
  0x55   :  { %2973 = vmatpush3.bf16.msra.mxu1 %v2972_v47  ;;  %2995 = vmatprep.subr.bf16.mxu0 %v3334_v0 }
  0x56   :  { %2974 = vmatprep.subr.bf16.mxu1 %v3334_v0 }
  0x58   :  { %2997 = vmatpush3.bf16.msra.mxu0 %v2996_v52 }
  0x59   :  { %2976 = vmatpush3.bf16.msra.mxu1 %v2975_v53  ;;  %2998 = vmatprep.subr.bf16.mxu0 %v3334_v0 }
  0x5a   :  { %3001 = vmatprep.subr.bf16.mxu1 %v3334_v0 }
  0x5c   :  { %3000 = vmatpush3.bf16.msra.mxu0 %v2999_v56  ;;  %2556 = vmatmul.mubr.f32.vlgmr.msra.gmra.mrb[0].mxu1 %v3469_v2  ;;  %v741_v56 = vld [vmem:[#allocation5 + $0x88] sm:$0xff] }
  0x5d   :  { %2558 = vmatprep.mubr.msk.f32.mxu1 %vm4436_vm0, %v3336_v1  ;;  %3004 = vmatprep.subr.bf16.mxu0 %v3334_v0 }
  0x60   :  { %2559 = vmatmul.mubr.f32.gmra.mrb[2].mxu1 %v3474_v3 }
  0x61   :  { %2561 = vmatprep.mubr.msk.f32.mxu1 %vm4436_vm0, %v3336_v1 }
  0x64   :  { %2562 = vmatmul.mubr.f32.gmra.mrb[4].mxu1 %v3482_v12  ;;  %v3552_v12 = vand.u32 127, %v93_v7 }
  0x65   :  { %2611 = vmatprep.mubr.msk.f32.mxu1 %vm4436_vm0, %v3336_v1 }
  0x66   :  { %vm100_vm2 = vcmp.eq.s32.totalorder %v3550_v11, %v3552_v12  ;;  %vm99_vm3 = vcmp.eq.s32.totalorder %v3544_v8, %v3552_v12  ;;  %vm101_vm4 = vcmp.eq.s32.totalorder %v3585_v32, %v3552_v12  ;;  %vm4439_vm5 = vcmp.lt.s32.totalorder %v3552_v12, %v3550_v11 }
  0x67   :  { %v3580_v30 = vsel %vm100_vm2, 1.0, %v3336_v1  ;;  %v3598_v40 = vsel %vm99_vm3, 1.0, %v3336_v1  ;;  %v3611_v46 = vsel %vm101_vm4, 1.0, %v3336_v1  ;;  %vm4440_vm6 = vcmp.lt.s32.totalorder %v3552_v12, %v3544_v8 }
  0x68   :  { %v113_v36 = vmul.f32 %v3580_v30, %v3572_v25  ;;  %v112_v43 = vmul.f32 %v3598_v40, %v3572_v25  ;;  %v130_v44 = vmul.f32 %v3580_v30, %v3591_v37  ;;  %v129_v49 = vmul.f32 %v3598_v40, %v3591_v37 }
  0x69   :  { %v131_v50 = vmul.f32 %v3611_v46, %v3591_v37  ;;  %v114_v53 = vmul.f32 %v3611_v46, %v3572_v25  ;;  %vm4442_vm7 = vcmp.lt.s32.totalorder %v3552_v12, %v3585_v32  ;;  %vm4446_vm3 = vcmask 195584  }
  0x6a   :  { %v119_v42 = vsel %vm4438_vm1, %v113_v36, 0.0  ;;  %v116_v47 = vsel %vm4438_vm1, %v112_v43, 0.0  ;;  %v135_v48 = vsel %vm4438_vm1, %v130_v44, 0.0  ;;  %v132_v51 = vsel %vm4438_vm1, %v129_v49, 0.0 }
  0x6b   :  { %v138_v52 = vsel %vm4438_vm1, %v131_v50, 0.0  ;;  %v122_v54 = vsel %vm4438_vm1, %v114_v53, 0.0 }
 0x112   :  { %v225_v57 = vpop.f32.mrb[0].mxu0 }
 0x113   :  { %v2516_v58 = vpop.f32.mrb[1].mxu0  ;;  %2597 = vmatmul.mubr.f32.vlgmr.msra.gmra.mrb[6].mxu0 %v225_v57  ;;  %v742_v57 = vld [vmem:[#allocation5 + $0x90] sm:$0xff] }
 0x114   :  { %2599 = vmatprep.mubr.msk.f32.mxu0 %vm4436_vm0, %v3336_v1  ;;  %v3005_v58 = vpack.c.bf16 %v741_v56, %v740_v55 }
 0x116   :  { %v230_v59 = vpop.f32.mrb[2].mxu0  ;;  %3006 = vmatpush3.bf16.msra.mxu0 %v3005_v58 }
 0x117   :  { %v2519_v60 = vpop.f32.mrb[3].mxu0  ;;  %2600 = vmatmul.mubr.f32.gmra.mrb[8].mxu0 %v230_v59  ;;  %v743_v59 = vld [vmem:[#allocation5 + $0x98] sm:$0xff]  ;;  %3007 = vmatprep.subr.bf16.mxu0 %v3334_v0 }
 0x118   :  { %2602 = vmatprep.mubr.msk.f32.mxu0 %vm4436_vm0, %v3336_v1  ;;  %v3008_v60 = vpack.c.bf16 %v743_v59, %v742_v57 }
 0x11a   :  { %v235_v61 = vpop.f32.mrb[4].mxu0  ;;  %3009 = vmatpush3.bf16.msra.mxu0 %v3008_v60 }
 0x11b   :  { %v2522_v62 = vpop.f32.mrb[5].mxu0  ;;  %2603 = vmatmul.mubr.f32.gmra.mrb[10].mxu0 %v235_v61  ;;  %v744_v61 = vld [vmem:[#allocation5 + $0xa0] sm:$0xff]  ;;  %3010 = vmatprep.subr.bf16.mxu0 %v3334_v0 }
 0x11c   :  { %2652 = vmatprep.mubr.msk.f32.mxu0 %vm4436_vm0, %v3336_v1  ;;  %v745_v62 = vld [vmem:[#allocation5 + $0xa8] sm:$0xff] }
 0x12f   :  { %v337_v63 = vpop.f32.mrb[0].mxu1 }
 0x130   :  { %v2557_v2 = vpop.f32.mrb[1].mxu1 }
 0x131   :  { %v746_v2 = vld [vmem:[#allocation5 + $0xb0] sm:$0xff] }
 0x133   :  { %v342_v3 = vpop.f32.mrb[2].mxu1 }
 0x134   :  { %v2560_v4 = vpop.f32.mrb[3].mxu1 }
 0x137   :  { %v347_v5 = vpop.f32.mrb[4].mxu1 }
 0x138   :  { %v2563_v6 = vpop.f32.mrb[5].mxu1 }
 0x139   :  { %v749_v6 = vld [vmem:[#allocation5 + $0xc8] sm:$0xff] }
 0x1e6   :  { %v417_v9 = vpop.f32.mrb[6].mxu0 }
 0x1e7   :  { %v418_v14 = vadd.f32 %v417_v9, %v337_v63  ;;  %v2598_v15 = vpop.f32.mrb[7].mxu0  ;;  %v3011_v63 = vpack.c.bf16 %v745_v62, %v744_v61  ;;  %v750_v9 = vld [vmem:[#allocation5 + $0xd0] sm:$0xff] }
 0x1e8   :  { %v752_v15 = vld [vmem:[#allocation5 + $0xe0] sm:$0xff] }
 0x1e9   :  { %v3557_v17 = vadd.f32 %v2251_v10, %v418_v14  ;;  %3012 = vmatpush3.bf16.msra.mxu0 %v3011_v63 }
 0x1ea   :  { %v422_v19 = vpop.f32.mrb[8].mxu0  ;;  %3013 = vmatprep.subr.bf16.mxu0 %v3334_v0 }
 0x1eb   :  { %v423_v22 = vadd.f32 %v422_v19, %v342_v3  ;;  %v2601_v23 = vpop.f32.mrb[9].mxu0  ;;  %v441_v24 = vmax.f32 %v3557_v17, 0.0  ;;  %v747_v3 = vld [vmem:[#allocation5 + $0xb8] sm:$0xff]  ;;  %v753_v19 = vld [vmem:[#allocation5 + $0xe8] sm:$0xff] }
 0x1ec   :  { %v3014_v4 = vpack.c.bf16 %v747_v3, %v746_v2 }
 0x1ed   :  { %v3575_v28 = vadd.f32 %v2251_v10, %v423_v22  ;;  %v451_v29 = vmul.f32 %v2252_v21, %v441_v24 }
 0x1ee   :  { %v427_v31 = vpop.f32.mrb[10].mxu0  ;;  %3015 = vmatpush3.bf16.msra.mxu0 %v3014_v4 }
 0x1ef   :  { %v442_v33 = vmax.f32 %v3575_v28, 0.0  ;;  %v428_v34 = vadd.f32 %v427_v31, %v347_v5  ;;  %454 = vadd.xlane.f32.xlu0 %v451_v29  ;;  %v2604_v35 = vpop.f32.mrb[11].mxu0  ;;  %v748_v5 = vld [vmem:[#allocation5 + $0xc0] sm:$0xff]  ;;  %3016 = vmatprep.subr.bf16.mxu0 %v3334_v0 }
 0x1f0   :  { %v3017_v7 = vpack.c.bf16 %v749_v6, %v748_v5 }
 0x1f1   :  { %v452_v38 = vmul.f32 %v2252_v21, %v442_v33  ;;  %v3595_v39 = vadd.f32 %v2251_v10, %v428_v34  ;;  %v751_v10 = vld [vmem:[#allocation5 + $0xd8] sm:$0xff] }
 0x1f2   :  { %3018 = vmatpush3.bf16.msra.mxu0 %v3017_v7  ;;  %v3020_v14 = vpack.c.bf16 %v751_v10, %v750_v9 }
 0x1f3   :  { %456 = vadd.xlane.f32.xlu0 %v452_v38  ;;  %v443_v41 = vmax.f32 %v3595_v39, 0.0  ;;  %3019 = vmatprep.subr.bf16.mxu0 %v3334_v0 }
 0x1f5   :  { %v453_v45 = vmul.f32 %v2252_v21, %v443_v41  ;;  %v3023_v21 = vpack.c.bf16 %v753_v19, %v752_v15 }
 0x1f6   :  { %3021 = vmatpush3.bf16.msra.mxu0 %v3020_v14 }
 0x1f7   :  { %458 = vadd.xlane.f32.xlu1 %v453_v45  ;;  %120 = vadd.xlane.f32.xlu0 %v119_v42 }
 0x1f8   :  { %3022 = vmatprep.subr.bf16.mxu0 %v3334_v0 }
 0x1fa   :  { %3024 = vmatpush3.bf16.msra.mxu0 %v3023_v21 }
 0x1fb   :  { %117 = vadd.xlane.f32.xlu1 %v116_v47  ;;  %136 = vadd.xlane.f32.xlu0 %v135_v48 }
 0x1fc   :  { %3025 = vmatprep.subr.bf16.mxu0 %v3334_v0 }
 0x1ff   :  { %133 = vadd.xlane.f32.xlu1 %v132_v51  ;;  %139 = vadd.xlane.f32.xlu0 %v138_v52 }
 0x203   :  { %123 = vadd.xlane.f32.xlu1 %v122_v54 }
 0x27c   :  { %v455_v22 = vpop.xlane.xlu0 %454 }
 0x27d   :  { %3209 = vtanh.f32 %v455_v22 }
 0x280   :  { %v457_v23 = vpop.xlane.xlu0 %456 }
 0x281   :  { %3211 = vtanh.f32 %v457_v23 }
 0x284   :  { %v459_v26 = vpop.xlane.xlu1 %458  ;;  %v3645_v44 = vpop.xlane.xlu0 %120 }
 0x285   :  { %3213 = vtanh.f32 %v459_v26  ;;  %v142_v56 = vmul.f32 %v3645_v44, %v3572_v25 }
 0x287   :  { %v3631_v29 = vpop.eup %3209 }
 0x288   :  { %v463_v34 = vmul.f32 %v3631_v29, %v3598_v40  ;;  %v3647_v47 = vpop.xlane.xlu1 %117  ;;  %v3650_v51 = vpop.xlane.xlu0 %136 }
 0x289   :  { %v145_v57 = vmul.f32 %v3650_v51, %v3591_v37  ;;  %v141_v62 = vmul.f32 %v3647_v47, %v3572_v25 }
 0x28a   :  { %v466_v43 = vsel %vm4438_vm1, %v463_v34, 0.0 }
 0x28b   :  { %v3633_v31 = vpop.eup %3211  ;;  %v3670_v63 = vadd.f32 %v145_v57, %v142_v56  ;;  %v552_v56 = vmul.f32 10.0, %v3650_v51  ;;  %v545_v57 = vmul.f32 10.0, %v3647_v47 }
 0x28c   :  { %v464_v35 = vmul.f32 %v3633_v31, %v3580_v30  ;;  %v3652_v53 = vpop.xlane.xlu1 %133  ;;  %v3658_v58 = vpop.xlane.xlu0 %139 }
 0x28d   :  { %v144_v2 = vmul.f32 %v3652_v53, %v3591_v37  ;;  %v146_v3 = vmul.f32 %v3658_v58, %v3591_v37 }
 0x28e   :  { %v467_v36 = vsel %vm4438_vm1, %v464_v35, 0.0 }
 0x28f   :  { %v3640_v38 = vpop.eup %3213  ;;  %v468_v45 = vadd.f32 %v467_v36, %v466_v43  ;;  %v3697_v37 = vadd.f32 %v144_v2, %v141_v62  ;;  %v576_v2 = vmul.f32 %v3633_v31, %v442_v33  ;;  %v575_v33 = vmul.f32 %v3631_v29, %v441_v24 }
 0x290   :  { %v465_v42 = vmul.f32 %v3640_v38, %v3611_v46  ;;  %v3660_v60 = vpop.xlane.xlu1 %123  ;;  %v577_v17 = vmul.f32 %v3640_v38, %v443_v41 }
 0x291   :  { %v143_v4 = vmul.f32 %v3660_v60, %v3572_v25 }
 0x292   :  { %v469_v48 = vsel %vm4438_vm1, %v465_v42, 0.0 }
 0x293   :  { %v470_v49 = vadd.f32 %v469_v48, %v468_v45  ;;  %v3699_v5 = vadd.f32 %v146_v3, %v143_v4  ;;  %v547_v3 = vmul.f32 10.0, %v3660_v60  ;;  %v553_v4 = vmul.f32 10.0, %v3658_v58 }
 0x295   :  { %v471_v50 = vrot.slane %v470_v49, 4 }
 0x297   :  { %v472_v52 = vadd.f32 %v471_v50, %v470_v49  ;;  %v754_v50 = vld [vmem:[#allocation5 + $0xf0] sm:$0xff] }
 0x299   :  { %v473_v54 = vrot.slane %v472_v52, 2 }
 0x29b   :  { %v474_v55 = vadd.f32 %v473_v54, %v472_v52  ;;  %v755_v52 = vld [vmem:[#allocation5 + $0xf8] sm:$0xff] }
 0x29c   :  { %v3026_v54 = vpack.c.bf16 %v755_v52, %v754_v50 }
 0x29d   :  { %v475_v59 = vrot.slane %v474_v55, 1 }
 0x29e   :  { %3027 = vmatpush3.bf16.msra.mxu0 %v3026_v54 }
 0x29f   :  { %v476_v61 = vadd.f32 %v475_v59, %v474_v55  ;;  %3052 = vmatprep.subr.bf16.mxu0 %v3334_v0  ;;  %v546_v55 = vmul.f32 10.0, %v3645_v44  ;;  %v551_v59 = vmul.f32 10.0, %v3652_v53 }
 0x2a1   :  { %vm478_vm8 = vcmp.gt.f32.partialorder %v476_v61, %v3633_v31  ;;  %vm481_vm9 = vcmp.eq.f32.partialorder %v476_v61, %v3633_v31  ;;  %vm480_vm10 = vcmp.eq.f32.partialorder %v476_v61, %v3631_v29  ;;  %vm477_vm12 = vcmp.gt.f32.partialorder %v476_v61, %v3631_v29 }
 0x2a2   :  { %vm487_vm11 = vmand %vm481_vm9, %vm4439_vm5  ;;  %vm482_vm13 = vcmp.eq.f32.partialorder %v476_v61, %v3640_v38  ;;  %vm498_vm14 = vcmp.gt.f32.partialorder %v3631_v29, %v476_v61  ;;  %vm499_vm15 = vcmp.gt.f32.partialorder %v3633_v31, %v476_v61  ;;  %vm501_vm4 = vcmp.eq.f32.partialorder %v3631_v29, %v476_v61 }
 0x2a3   :  { %vm490_vm2 = vmor %vm478_vm8, %vm487_vm11  ;;  %vm502_vm0 = vcmp.eq.f32.partialorder %v3633_v31, %v476_v61  ;;  %vm503_vm1 = vcmp.eq.f32.partialorder %v3640_v38, %v476_v61  ;;  %vm479_vm5 = vcmp.gt.f32.partialorder %v476_v61, %v3640_v38  ;;  %vm4445_vm11 = vcmp.lt.s32.totalorder %v3544_v8, %v3552_v12 }
 0x2a4   :  { %v2254_v25 = vsel %vm490_vm2, 1.0, %v3336_v1  ;;  %vm486_vm9 = vmand %vm480_vm10, %vm4440_vm6  ;;  %vm4444_vm2 = vcmp.lt.s32.totalorder %v3550_v11, %v3552_v12  ;;  %vm4443_vm6 = vcmp.lt.s32.totalorder %v3585_v32, %v3552_v12 }
 0x2a5   :  { %v520_v6 = vmul.f32 %v2254_v25, %v3670_v63  ;;  %vm489_vm8 = vmor %vm477_vm12, %vm486_vm9 }
 0x2a6   :  { %v2253_v7 = vsel %vm489_vm8, 1.0, %v3336_v1  ;;  %vm488_vm10 = vmand %vm482_vm13, %vm4442_vm7 }
 0x2a7   :  { %v525_v9 = vsel %vm4446_vm3, %v520_v6, 0.0  ;;  %v519_v10 = vmul.f32 %v2253_v7, %v3697_v37  ;;  %vm491_vm12 = vmor %vm479_vm5, %vm488_vm10  ;;  %v554_v6 = vadd.f32 %v551_v59, %v545_v57  ;;  %v726_v57 = vld [vmem:[#allocation2 + $0x98] sm:$0xff] }
 0x2a8   :  { %526 = vadd.xlane.f32.xlu0 %v525_v9  ;;  %v2255_v14 = vsel %vm491_vm12, 1.0, %v3336_v1  ;;  %vm507_vm9 = vmand %vm501_vm4, %vm4445_vm11  ;;  %vm4449_vm12 = vcmp.gt.f32.partialorder %v3640_v38, %v476_v61  ;;  %v555_v61 = vadd.f32 %v552_v56, %v546_v55  ;;  %v725_v56 = vld [vmem:[#allocation2 + $0x90] sm:$0xff] }
 0x2a9   :  { %vm4447_vm8 = vmmov %vm4446_vm3  ;;  %v521_v19 = vmul.f32 %v2255_v14, %v3699_v5  ;;  %v556_v14 = vadd.f32 %v553_v4, %v547_v3  ;;  %v727_v4 = vld [vmem:[#allocation2 + $0xa0] sm:$0xff] }
 0x2aa   :  { %v522_v15 = vsel %vm4447_vm8, %v519_v10, 0.0  ;;  %vm508_vm13 = vmand %vm502_vm0, %vm4444_vm2 }
 0x2ab   :  { %523 = vadd.xlane.f32.xlu1 %v522_v15  ;;  %vm509_vm5 = vmand %vm503_vm1, %vm4443_vm6 }
 0x2ac   :  { %vm510_vm3 = vmor %vm498_vm14, %vm507_vm9 }
 0x2ad   :  { %vm511_vm4 = vmor %vm499_vm15, %vm508_vm13  ;;  %v2256_v21 = vsel %vm510_vm3, 1.0, %v3336_v1 }
 0x2ae   :  { %vm4448_vm10 = vmmov %vm4447_vm8  ;;  %v2257_v23 = vsel %vm511_vm4, 1.0, %v3336_v1  ;;  %v531_v26 = vmul.f32 %v2256_v21, %v3697_v37 }
 0x2af   :  { %v528_v22 = vsel %vm4448_vm10, %v521_v19, 0.0  ;;  %vm512_vm0 = vmor %vm4449_vm12, %vm509_vm5  ;;  %v532_v35 = vmul.f32 %v2257_v23, %v3670_v63  ;;  %vm4453_vm12 = vmmov 0  }
 0x2b0   :  { %529 = vadd.xlane.f32.xlu1 %v528_v22  ;;  %v2258_v34 = vsel %vm512_vm0, 1.0, %v3336_v1  ;;  %vm4450_vm1 = vmmov %vm4447_vm8 }
 0x2b1   :  { %v533_v36 = vmul.f32 %v2258_v34, %v3699_v5  ;;  %v534_v42 = vsel %vm4450_vm1, %v531_v26, 0.0  ;;  %vm4451_vm14 = vmmov %vm4450_vm1 }
 0x2b2   :  { %v535_v43 = vsel %vm4451_vm14, %v532_v35, 0.0  ;;  %vm4452_vm15 = vmmov %vm4450_vm1 }
 0x2b3   :  { %v536_v45 = vadd.f32 %v535_v43, %v534_v42  ;;  %v537_v48 = vsel %vm4452_vm15, %v533_v36, 0.0  ;;  %v723_v42 = vld [vmem:[#allocation2 + $0x80] sm:$0xff]  ;;  %v724_v43 = vld [vmem:[#allocation2 + $0x88] sm:$0xff]  ;;  %vm4454_vm15 = vmmov %vm4451_vm14 }
 0x2b4   :  { %v3029_v54 = vpack.c.bf16 %v724_v43, %v723_v42  ;;  %v737_v43 = vld [vmem:[#allocation2 + $0xf0] sm:$0xff] }
 0x2b5   :  { %v3752_v49 = vadd.f32 %v537_v48, %v536_v45 }
 0x335   :  { %v527_v62 = vpop.xlane.xlu0 %526 }
 0x336   :  { %vm564_vm9 = vcmp.lt.f32.partialorder %v527_v62, %v555_v61 }
 0x337   :  { %v3765_v25 = vsel %vm564_vm9, 1.0, %v3336_v1  ;;  %vm4455_vm9 = vmmov %vm4451_vm14 }
 0x338   :  { %v524_v7 = vpop.xlane.xlu1 %523  ;;  %v579_v9 = vmul.f32 %v3765_v25, %v576_v2  ;;  %v594_v10 = vmul.f32 %v3765_v25, %v3645_v44  ;;  %v617_v28 = vmul.f32 %v3765_v25, %v3650_v51  ;;  %v3032_v2 = vpack.c.bf16 %v726_v57, %v725_v56 }
 0x339   :  { %vm563_vm8 = vcmp.lt.f32.partialorder %v524_v7, %v554_v6  ;;  %v728_v6 = vld [vmem:[#allocation2 + $0xa8] sm:$0xff] }
 0x33a   :  { %vm597_vm13 = vcmp.gt.f32.partialorder %v594_v10, 0.0  ;;  %vm620_vm5 = vcmp.gt.f32.partialorder %v617_v28, 0.0  ;;  %v3776_v31 = vsel %vm563_vm8, 1.0, %v3336_v1  ;;  %v3035_v10 = vpack.c.bf16 %v728_v6, %v727_v4 }
 0x33b   :  { %v578_v15 = vmul.f32 %v3776_v31, %v575_v33  ;;  %v593_v19 = vmul.f32 %v3776_v31, %v3647_v47  ;;  %v606_v22 = vsel %vm597_vm13, %v579_v9, -1e+30  ;;  %v616_v23 = vmul.f32 %v3776_v31, %v3652_v53  ;;  %v729_v33 = vld [vmem:[#allocation2 + $0xb0] sm:$0xff]  ;;  %vm4456_vm13 = vmmov %vm4455_vm9 }
 0x33c   :  { %v629_v24 = vsel %vm620_vm5, %v579_v9, -1e+30  ;;  %vm4441_vm8 = vcmask 1040384   ;;  %vm4457_vm5 = vmmov %vm4455_vm9 }
 0x33d   :  { %v530_v21 = vpop.xlane.xlu1 %529  ;;  %vm596_vm4 = vcmp.gt.f32.partialorder %v593_v19, 0.0  ;;  %2653 = vmatmul.mubr.f32.vlgmr.msra.gmra.mrb[12].mxu0 %v578_v15  ;;  %v3789_v26 = vpack.c.bf16 %v579_v9, %v578_v15  ;;  %vm619_vm10 = vcmp.gt.f32.partialorder %v616_v23, 0.0  ;;  %v732_v23 = vld [vmem:[#allocation2 + $0xc8] sm:$0xff] }
 0x33e   :  { %vm565_vm3 = vcmp.lt.f32.partialorder %v530_v21, %v556_v14  ;;  %v605_v34 = vsel %vm596_vm4, %v578_v15, -1e+30  ;;  %2655 = vmatprep.mubr.msk.f32.mxu0 %vm4453_vm12, %v3336_v1  ;;  %v628_v41 = vsel %vm619_vm10, %v578_v15, -1e+30  ;;  %v730_v14 = vld [vmem:[#allocation2 + $0xb8] sm:$0xff] }
 0x33f   :  { %v3787_v29 = vsel %vm565_vm3, 1.0, %v3336_v1  ;;  %v608_v39 = vmax.f32 %v605_v34, %v606_v22  ;;  %3003 = vmatpush3.bf16.msra.mxu1 %v3789_v26  ;;  %v631_v45 = vmax.f32 %v628_v41, %v629_v24  ;;  %v731_v22 = vld [vmem:[#allocation2 + $0xc0] sm:$0xff]  ;;  %vm4458_vm3 = vmmov %vm4457_vm5 }
 0x340   :  { %v3792_v35 = vmul.f32 %v3787_v29, %v577_v17  ;;  %v595_v36 = vmul.f32 %v3787_v29, %v3660_v60  ;;  %v618_v38 = vmul.f32 %v3787_v29, %v3658_v58  ;;  %2609 = vmatprep.subr.mxu1 %v3336_v1  ;;  %v3041_v34 = vpack.c.bf16 %v732_v23, %v731_v22  ;;  %v735_v41 = vld [vmem:[#allocation2 + $0xe0] sm:$0xff] }
 0x341   :  { %2656 = vmatmul.mubr.f32.gmra.mrb[14].mxu0 %v579_v9 }
 0x342   :  { %vm598_vm0 = vcmp.gt.f32.partialorder %v595_v36, 0.0  ;;  %vm621_vm1 = vcmp.gt.f32.partialorder %v618_v38, 0.0  ;;  %2658 = vmatprep.mubr.msk.f32.mxu0 %vm4453_vm12, %v3336_v1  ;;  %v734_v36 = vld [vmem:[#allocation2 + $0xd8] sm:$0xff]  ;;  %v736_v38 = vld [vmem:[#allocation2 + $0xe8] sm:$0xff] }
 0x343   :  { %v607_v48 = vsel %vm598_vm0, %v3792_v35, -1e+30  ;;  %v630_v52 = vsel %vm621_vm1, %v3792_v35, -1e+30  ;;  %2610 = vmatpush3.msra.mxu1 %v3792_v35  ;;  %v3047_v42 = vpack.c.bf16 %v736_v38, %v735_v41 }
 0x344   :  { %v609_v50 = vmax.f32 %v608_v39, %v607_v48  ;;  %v632_v55 = vmax.f32 %v631_v45, %v630_v52  ;;  %2612 = vmatmul.mubr.msk.f32.vlgmr.msra.gmra.mrb[6].mxu1 %vm4451_vm14, %v3487_v13  ;;  %3028 = vmatprep.subr.bf16.mxu1 %v3334_v0  ;;  %v738_v45 = vld [vmem:[#allocation2 + $0xf8] sm:$0xff] }
 0x345   :  { %2659 = vmatmul.mubr.f32.gmra.mrb[16].mxu0 %v3792_v35  ;;  %2614 = vmatprep.mubr.msk.f32.mxu1 %vm4453_vm12, %v3336_v1  ;;  %v3050_v48 = vpack.c.bf16 %v738_v45, %v737_v43  ;;  %v539_v43 = vrot.slane %v3752_v49, 4 }
 0x346   :  { %v610_v59 = vrot.slane %v609_v50, 4  ;;  %v633_v61 = vrot.slane %v632_v55, 4  ;;  %3030 = vmatpush3.bf16.msra.mxu1 %v3029_v54  ;;  %2708 = vmatprep.mubr.msk.f32.mxu0 %vm4453_vm12, %v3336_v1 }
 0x347   :  { %3031 = vmatprep.subr.bf16.mxu1 %v3334_v0 }
 0x348   :  { %v611_v62 = vmax.f32 %v609_v50, %v610_v59  ;;  %v634_v3 = vmax.f32 %v632_v55, %v633_v61  ;;  %2615 = vmatmul.mubr.msk.f32.gmra.mrb[8].mxu1 %vm4454_vm15, %v3499_v20  ;;  %v3038_v20 = vpack.c.bf16 %v730_v14, %v729_v33  ;;  %v2269_v33 = vld [vmem:[%s4428_s6 + $0x1] ss:$0 sm:$0xff]  ;;  %vm4459_vm15 = vcmp.lt.s32.totalorder %v3552_v12, %v3550_v11 }
 0x349   :  { %2617 = vmatprep.mubr.msk.f32.mxu1 %vm4453_vm12, %v3336_v1 }
 0x34a   :  { %v612_v13 = vrot.slane %v611_v62, 2  ;;  %v635_v7 = vrot.slane %v634_v3, 2  ;;  %3033 = vmatpush3.bf16.msra.mxu1 %v3032_v2 }
 0x34b   :  { %3034 = vmatprep.subr.bf16.mxu1 %v3334_v0 }
 0x34c   :  { %v613_v9 = vmax.f32 %v611_v62, %v612_v13  ;;  %v636_v28 = vmax.f32 %v634_v3, %v635_v7  ;;  %2618 = vmatmul.mubr.msk.f32.gmra.mrb[10].mxu1 %vm4455_vm9, %v3510_v27  ;;  %v733_v27 = vld [vmem:[#allocation2 + $0xd0] sm:$0xff]  ;;  %v2267_v13 = vld [vmem:[%s4427_s5 + $0x1] ss:$0 sm:$0xff] }
 0x34d   :  { %2693 = vmatprep.mubr.msk.f32.mxu1 %vm4453_vm12, %v3336_v1  ;;  %v3044_v39 = vpack.c.bf16 %v734_v36, %v733_v27 }
 0x34e   :  { %v614_v15 = vrot.slane %v613_v9, 1  ;;  %v637_v19 = vrot.slane %v636_v28, 1  ;;  %3036 = vmatpush3.bf16.msra.mxu1 %v3035_v10 }
 0x34f   :  { %3037 = vmatprep.subr.bf16.mxu1 %v3334_v0 }
 0x350   :  { %v615_v21 = vmax.f32 %v613_v9, %v614_v15  ;;  %v638_v17 = vmax.f32 %v636_v28, %v637_v19 }
 0x352   :  { %v3827_v24 = vsel %vm4441_vm8, %v615_v21, %v638_v17  ;;  %3039 = vmatpush3.bf16.msra.mxu1 %v3038_v20 }
 0x353   :  { %3040 = vmatprep.subr.bf16.mxu1 %v3334_v0 }
 0x356   :  { %3042 = vmatpush3.bf16.msra.mxu1 %v3041_v34 }
 0x357   :  { %3043 = vmatprep.subr.bf16.mxu1 %v3334_v0 }
 0x35a   :  { %3045 = vmatpush3.bf16.msra.mxu1 %v3044_v39 }
 0x35b   :  { %3046 = vmatprep.subr.bf16.mxu1 %v3334_v0 }
 0x35e   :  { %3048 = vmatpush3.bf16.msra.mxu1 %v3047_v42 }
 0x35f   :  { %3049 = vmatprep.subr.bf16.mxu1 %v3334_v0 }
 0x362   :  { %3051 = vmatpush3.bf16.msra.mxu1 %v3050_v48  ;;  %v540_v48 = vadd.f32 %v539_v43, %v3752_v49  ;;  %v1019_v43 = vmul.f32 %v3776_v31, %v3697_v37 }
 0x363   :  { %3058 = vmatprep.subr.bf16.mxu1 %v3334_v0 }
 0x410   :  { %v822_v50 = vpop.f32.mrb[12].mxu0 }
 0x411   :  { %v2654_v52 = vpop.f32.mrb[13].mxu0 }
 0x412   :  { %v541_v52 = vrot.slane %v540_v48, 2 }
 0x414   :  { %v827_v54 = vpop.f32.mrb[14].mxu0 }
 0x415   :  { %v2657_v55 = vpop.f32.mrb[15].mxu0 }
 0x417   :  { %v708_v56 = vpop.f32.mrb[6].mxu1 }
 0x418   :  { %v2613_v57 = vpop.f32.mrb[7].mxu1  ;;  %v832_v59 = vpop.f32.mrb[16].mxu0  ;;  %2694 = vmatmul.mubr.f32.vlgmr.msra.gmra.mrb[12].mxu1 %v708_v56 }
 0x419   :  { %v2660_v61 = vpop.f32.mrb[17].mxu0  ;;  %2696 = vmatprep.mubr.msk.f32.mxu1 %vm4453_vm12, %v3336_v1  ;;  %v542_v57 = vadd.f32 %v541_v52, %v540_v48  ;;  %v1020_v48 = vmul.f32 %v3765_v25, %v3670_v63 }
 0x41b   :  { %v713_v62 = vpop.f32.mrb[8].mxu1 }
 0x41c   :  { %v2616_v2 = vpop.f32.mrb[9].mxu1  ;;  %2697 = vmatmul.mubr.f32.gmra.mrb[14].mxu1 %v713_v62 }
 0x41d   :  { %2699 = vmatprep.mubr.msk.f32.mxu1 %vm4453_vm12, %v3336_v1 }
 0x41f   :  { %v718_v3 = vpop.f32.mrb[10].mxu1 }
 0x420   :  { %v2619_v4 = vpop.f32.mrb[11].mxu1  ;;  %2700 = vmatmul.mubr.f32.gmra.mrb[16].mxu1 %v718_v3  ;;  %v543_v3 = vrot.slane %v542_v57, 1 }
 0x421   :  { %2726 = vmatprep.mubr.msk.f32.mxu1 %vm4453_vm12, %v3336_v1 }
 0x4eb   :  { %v902_v6 = vpop.f32.mrb[12].mxu1 }
 0x4ec   :  { %v903_v7 = vadd.f32 %v902_v6, %v822_v50  ;;  %v2695_v9 = vpop.f32.mrb[13].mxu1 }
 0x4ed   :  { %v544_v9 = vadd.f32 %v543_v3, %v542_v57 }
 0x4ee   :  { %v3843_v10 = vadd.f32 %v2267_v13, %v903_v7 }
 0x4ef   :  { %v907_v28 = vpop.f32.mrb[14].mxu1 }
 0x4f0   :  { %v927_v14 = vmax.f32 %v3843_v10, 0.0  ;;  %v908_v15 = vadd.f32 %v907_v28, %v827_v54  ;;  %v2698_v19 = vpop.f32.mrb[15].mxu1 }
 0x4f2   :  { %v3849_v20 = vadd.f32 %v2267_v13, %v908_v15  ;;  %v938_v21 = vmul.f32 %v2269_v33, %v927_v14 }
 0x4f3   :  { %v912_v22 = vpop.f32.mrb[16].mxu1 }
 0x4f4   :  { %v928_v23 = vmax.f32 %v3849_v20, 0.0  ;;  %v913_v17 = vadd.f32 %v912_v22, %v832_v59  ;;  %v2701_v34 = vpop.f32.mrb[17].mxu1  ;;  %941 = vadd.xlane.f32.xlu0 %v938_v21  ;;  %v557_v59 = vmul.f32 10.0, %v3562_v18 }
 0x4f6   :  { %v3854_v27 = vadd.f32 %v2267_v13, %v913_v17  ;;  %v939_v36 = vmul.f32 %v2269_v33, %v928_v23  ;;  %v560_v4 = vrot.slane %v557_v59, 1 }
 0x4f8   :  { %v929_v39 = vmax.f32 %v3854_v27, 0.0  ;;  %943 = vadd.xlane.f32.xlu1 %v939_v36  ;;  %v562_v28 = vadd.f32 %v560_v4, %v557_v59 }
 0x4fa   :  { %v940_v41 = vmul.f32 %v2269_v33, %v929_v39  ;;  %vm572_vm4 = vcmp.lt.f32.partialorder %v544_v9, %v562_v28 }
 0x4fb   :  { %v3880_v22 = vsel %vm572_vm4, 1.0, %v3336_v1 }
 0x4fc   :  { %945 = vadd.xlane.f32.xlu0 %v940_v41  ;;  %v1003_v36 = vrot.slane %v3880_v22, %v3555_v16 }
 0x4fe   :  { %v1005_v41 = vmul.f32 %v1003_v36, %v3670_v63  ;;  %v1004_v3 = vmul.f32 %v1003_v36, %v3697_v37  ;;  %v1006_v9 = vmul.f32 %v1003_v36, %v3699_v5 }
 0x581   :  { %v942_v38 = vpop.xlane.xlu0 %941 }
 0x582   :  { %3215 = vtanh.f32 %v942_v38 }
 0x585   :  { %v944_v42 = vpop.xlane.xlu1 %943 }
 0x586   :  { %3217 = vtanh.f32 %v944_v42 }
 0x589   :  { %v946_v45 = vpop.xlane.xlu0 %945 }
 0x58a   :  { %3219 = vtanh.f32 %v946_v45 }
 0x58c   :  { %v3863_v50 = vpop.eup %3215 }
 0x58d   :  { %v950_v55 = vmul.f32 %v3863_v50, %v3598_v40 }
 0x58f   :  { %v953_v2 = vsel %vm4457_vm5, %v950_v55, 0.0  ;;  %v1021_v55 = vmul.f32 %v3787_v29, %v3699_v5 }
 0x590   :  { %v3865_v54 = vpop.eup %3217 }
 0x591   :  { %v951_v56 = vmul.f32 %v3865_v54, %v3580_v30 }
 0x593   :  { %v954_v61 = vsel %vm4456_vm13, %v951_v56, 0.0 }
 0x594   :  { %v3873_v62 = vpop.eup %3219  ;;  %v955_v6 = vadd.f32 %v954_v61, %v953_v2 }
 0x595   :  { %v952_v49 = vmul.f32 %v3873_v62, %v3611_v46 }
 0x597   :  { %v956_v13 = vsel %vm4458_vm3, %v952_v49, 0.0 }
 0x598   :  { %v957_v7 = vadd.f32 %v956_v13, %v955_v6 }
 0x59a   :  { %v958_v33 = vrot.slane %v957_v7, 4 }
 0x59c   :  { %v959_v15 = vadd.f32 %v958_v33, %v957_v7 }
 0x59e   :  { %v960_v19 = vrot.slane %v959_v15, 2 }
 0x5a0   :  { %v961_v21 = vadd.f32 %v960_v19, %v959_v15 }
 0x5a2   :  { %v962_v17 = vrot.slane %v961_v21, 1 }
 0x5a4   :  { %v963_v34 = vadd.f32 %v962_v17, %v961_v21 }
 0x5a6   :  { %vm965_vm10 = vcmp.gt.f32.partialorder %v963_v34, %v3865_v54  ;;  %vm968_vm0 = vcmp.eq.f32.partialorder %v963_v34, %v3865_v54  ;;  %vm982_vm1 = vcmp.gt.f32.partialorder %v3863_v50, %v963_v34  ;;  %vm983_vm14 = vcmp.gt.f32.partialorder %v3865_v54, %v963_v34 }
 0x5a7   :  { %vm971_vm9 = vmand %vm968_vm0, %vm4459_vm15  ;;  %vm984_vm13 = vcmp.gt.f32.partialorder %v3873_v62, %v963_v34  ;;  %vm985_vm5 = vcmp.eq.f32.partialorder %v3863_v50, %v963_v34  ;;  %vm986_vm3 = vcmp.eq.f32.partialorder %v3865_v54, %v963_v34  ;;  %vm987_vm4 = vcmp.eq.f32.partialorder %v3873_v62, %v963_v34 }
 0x5a8   :  { %vm974_vm8 = vmor %vm965_vm10, %vm971_vm9  ;;  %vm967_vm9 = vcmp.eq.f32.partialorder %v963_v34, %v3863_v50 }
 0x5a9   :  { %v2271_v38 = vsel %vm974_vm8, 1.0, %v3336_v1  ;;  %vm988_vm7 = vmand %vm985_vm5, %vm4445_vm11  ;;  %vm4460_vm8 = vcmask 195584  }
 0x5aa   :  { %vm989_vm0 = vmand %vm986_vm3, %vm4444_vm2  ;;  %v1008_v42 = vmul.f32 %v2271_v38, %v1005_v41  ;;  %vm964_vm3 = vcmp.gt.f32.partialorder %v963_v34, %v3863_v50 }
 0x5ab   :  { %vm990_vm15 = vmand %vm987_vm4, %vm4443_vm6 }
 0x5ac   :  { %vm991_vm10 = vmor %vm982_vm1, %vm988_vm7  ;;  %v1013_v45 = vsel %vm4460_vm8, %v1008_v42, 0.0  ;;  %vm969_vm1 = vcmp.eq.f32.partialorder %v963_v34, %v3873_v62 }
 0x5ad   :  { %vm992_vm5 = vmor %vm983_vm14, %vm989_vm0  ;;  %v2273_v52 = vsel %vm991_vm10, 1.0, %v3336_v1  ;;  %1014 = vadd.xlane.f32.xlu0 %v1013_v45  ;;  %vm4461_vm14 = vcmp.lt.s32.totalorder %v3552_v12, %v3544_v8  ;;  %vm966_vm0 = vcmp.gt.f32.partialorder %v963_v34, %v3873_v62 }
 0x5ae   :  { %vm993_vm7 = vmor %vm984_vm13, %vm990_vm15  ;;  %v2274_v56 = vsel %vm992_vm5, 1.0, %v3336_v1  ;;  %v1022_v57 = vmul.f32 %v2273_v52, %v1019_v43  ;;  %vm4464_vm15 = vcmp.lt.s32.totalorder %v3552_v12, %v3585_v32  ;;  %v1048_v43 = vmul.f32 8.0, %v3562_v18 }
 0x5af   :  { %v2275_v59 = vsel %vm993_vm7, 1.0, %v3336_v1  ;;  %v1023_v61 = vmul.f32 %v2274_v56, %v1020_v48  ;;  %vm970_vm4 = vmand %vm967_vm9, %vm4461_vm14  ;;  %v1037_v48 = vmul.f32 8.0, %v3645_v44  ;;  %v1043_v52 = vmul.f32 8.0, %v3650_v51 }
 0x5b0   :  { %v1024_v49 = vmul.f32 %v2275_v59, %v1021_v55  ;;  %vm4462_vm10 = vmmov %vm4460_vm8  ;;  %v1051_v36 = vrot.slane %v1048_v43, 1  ;;  %v1076_v59 = vmul.f32 0.125, %v3562_v18 }
 0x5b1   :  { %v1025_v2 = vsel %vm4462_vm10, %v1022_v57, 0.0  ;;  %vm973_vm8 = vmor %vm964_vm3, %vm970_vm4  ;;  %v1046_v57 = vadd.f32 %v1043_v52, %v1037_v48 }
 0x5b2   :  { %vm4463_vm13 = vmmov %vm4462_vm10  ;;  %v2270_v6 = vsel %vm973_vm8, 1.0, %v3336_v1  ;;  %v1053_v56 = vadd.f32 %v1051_v36, %v1048_v43  ;;  %v1070_v43 = vmul.f32 %v3863_v50, %v927_v14 }
 0x5b3   :  { %v1026_v4 = vsel %vm4463_vm13, %v1023_v61, 0.0  ;;  %vm972_vm5 = vmand %vm969_vm1, %vm4464_vm15  ;;  %v1007_v7 = vmul.f32 %v2270_v6, %v1004_v3  ;;  %v1036_v3 = vmul.f32 8.0, %v3647_v47  ;;  %v1079_v6 = vrot.slane %v1076_v59, 1 }
 0x5b4   :  { %v1027_v13 = vadd.f32 %v1026_v4, %v1025_v2  ;;  %vm975_vm7 = vmor %vm966_vm0, %vm972_vm5  ;;  %v1042_v4 = vmul.f32 8.0, %v3652_v53 }
 0x5b5   :  { %vm4465_vm9 = vmmov %vm4462_vm10  ;;  %v2272_v33 = vsel %vm975_vm7, 1.0, %v3336_v1 }
 0x5b6   :  { %v1028_v28 = vsel %vm4465_vm9, %v1024_v49, 0.0  ;;  %vm4466_vm3 = vmmov %vm4465_vm9  ;;  %v1009_v21 = vmul.f32 %v2272_v33, %v1006_v9  ;;  %v1045_v33 = vadd.f32 %v1042_v4, %v1036_v3  ;;  %v1072_v4 = vmul.f32 %v3873_v62, %v929_v39 }
 0x5b7   :  { %v1029_v15 = vadd.f32 %v1028_v28, %v1027_v13  ;;  %v1010_v19 = vsel %vm4466_vm3, %v1007_v7, 0.0  ;;  %vm4467_vm14 = vmmov %vm4466_vm3  ;;  %v581_v7 = vmul.f32 0.1, %v3562_v18 }
 0x5b8   :  { %1011 = vadd.xlane.f32.xlu1 %v1010_v19  ;;  %v1016_v17 = vsel %vm4467_vm14, %v1009_v21, 0.0  ;;  %v1081_v19 = vadd.f32 %v1079_v6, %v1076_v59  ;;  %v1071_v21 = vmul.f32 %v3865_v54, %v928_v23  ;;  %vm4468_vm14 = vmmov %vm4466_vm3 }
 0x5b9   :  { %v1030_v34 = vrot.slane %v1029_v15, 4 }
 0x5bb   :  { %v1031_v41 = vadd.f32 %v1030_v34, %v1029_v15  ;;  %v1044_v15 = vmul.f32 8.0, %v3658_v58  ;;  %v1038_v34 = vmul.f32 8.0, %v3660_v60 }
 0x5bc   :  { %1017 = vadd.xlane.f32.xlu1 %v1016_v17 }
 0x5bd   :  { %v1032_v38 = vrot.slane %v1031_v41, 2  ;;  %v1047_v54 = vadd.f32 %v1044_v15, %v1038_v34  ;;  %v1380_v34 = vld [vmem:[#allocation5 + $0x100] sm:$0xff] }
 0x5bf   :  { %v1033_v42 = vadd.f32 %v1032_v38, %v1031_v41  ;;  %v584_v41 = vrot.slane %v581_v7, 1 }
 0x5c1   :  { %v1034_v45 = vrot.slane %v1033_v42, 1 }
 0x5c3   :  { %v1035_v55 = vadd.f32 %v1034_v45, %v1033_v42 }
 0x5c5   :  { %vm1066_vm4 = vcmp.lt.f32.partialorder %v1035_v55, %v1053_v56  ;;  %v586_v55 = vadd.f32 %v584_v41, %v581_v7  ;;  %v1363_v7 = vld [vmem:[#allocation2 + $0x100] sm:$0xff]  ;;  %v1381_v41 = vld [vmem:[#allocation5 + $0x108] sm:$0xff] }
 0x5c6   :  { %v2279_v13 = vsel %vm1066_vm4, 1.0, %v3336_v1 }
 0x63a   :  { %v1015_v61 = vpop.xlane.xlu0 %1014 }
 0x63b   :  { %vm1055_vm1 = vcmp.lt.f32.partialorder %v1015_v61, %v1046_v57 }
 0x63c   :  { %v2277_v49 = vsel %vm1055_vm1, 1.0, %v3336_v1  ;;  %vm4469_vm1 = vmmov %vm4466_vm3 }
 0x63d   :  { %v3947_v2 = vmul.f32 %v2277_v49, %v3765_v25  ;;  %v3959_v25 = vmul.f32 %v2279_v13, %v3880_v22  ;;  %vm4470_vm4 = vmmov %vm4469_vm1 }
 0x63f   :  { %v1235_v9 = vmul.f32 %v3947_v2, %v3645_v44  ;;  %v1258_v28 = vmul.f32 %v3947_v2, %v3650_v51  ;;  %v3966_v38 = vmul.f32 %v1071_v21, %v3947_v2  ;;  %v1082_v23 = vmul.f32 %v1081_v19, %v3959_v25  ;;  %v1366_v21 = vld [vmem:[#allocation2 + $0x118] sm:$0xff] }
 0x641   :  { %vm1238_vm10 = vcmp.gt.f32.partialorder %v1235_v9, 0.0  ;;  %vm1261_vm8 = vcmp.gt.f32.partialorder %v1258_v28, 0.0  ;;  %v1086_v61 = vrot.slane %v1082_v23, %v3555_v16  ;;  %v1364_v9 = vld [vmem:[#allocation2 + $0x108] sm:$0xff]  ;;  %v587_v28 = vmul.f32 %v3880_v22, %v586_v55  ;;  %v3231_v22 = vld [vmem:[%s4422_s0] sm:$0xff] }
 0x642   :  { %v1247_v10 = vsel %vm1238_vm10, %v3966_v38, -1e+30  ;;  %v1270_v14 = vsel %vm1261_vm8, %v3966_v38, -1e+30  ;;  %v1368_v55 = vld [vmem:[#allocation2 + $0x128] sm:$0xff]  ;;  %vm4472_vm10 = vcmask 1040384  }
 0x643   :  { %v1087_v27 = vmul.f32 %v1086_v61, %v3562_v18  ;;  %v1365_v18 = vld [vmem:[#allocation2 + $0x110] sm:$0xff] }
 0x645   :  { %v1012_v17 = vpop.xlane.xlu1 %1011 }
 0x646   :  { %vm1054_vm0 = vcmp.lt.f32.partialorder %v1012_v17, %v1045_v33  ;;  %v3086_v33 = vpack.c.bf16 %v1364_v9, %v1363_v7  ;;  %v591_v17 = vrot.slane %v587_v28, %v3555_v16  ;;  %v1384_v7 = vld [vmem:[#allocation5 + $0x120] sm:$0xff]  ;;  %v1385_v9 = vld [vmem:[#allocation5 + $0x128] sm:$0xff] }
 0x647   :  { %v2276_v42 = vsel %vm1054_vm0, 1.0, %v3336_v1  ;;  %vm4471_vm0 = vmmov %vm4469_vm1 }
 0x648   :  { %v3973_v20 = vmul.f32 %v2276_v42, %v3776_v31  ;;  %vm4473_vm8 = vmmov %vm4471_vm0 }
 0x649   :  { %v1018_v45 = vpop.xlane.xlu1 %1017 }
 0x64a   :  { %v3977_v36 = vmul.f32 %v1070_v43, %v3973_v20  ;;  %v1234_v48 = vmul.f32 %v3973_v20, %v3647_v47  ;;  %v1257_v52 = vmul.f32 %v3973_v20, %v3652_v53  ;;  %vm1056_vm13 = vcmp.lt.f32.partialorder %v1018_v45, %v1047_v54  ;;  %v3232_v45 = vld [vmem:[%s4422_s0 + $0x8] sm:$0xff] }
 0x64b   :  { %v2278_v31 = vsel %vm1056_vm13, 1.0, %v3336_v1  ;;  %vm4474_vm13 = vmmov %vm4471_vm0 }
 0x64c   :  { %vm1237_vm15 = vcmp.gt.f32.partialorder %v1234_v48, 0.0  ;;  %vm1260_vm5 = vcmp.gt.f32.partialorder %v1257_v52, 0.0  ;;  %v3053_v50 = vpack.c.bf16 %v3966_v38, %v3977_v36  ;;  %v3991_v59 = vmul.f32 %v2278_v31, %v3787_v29  ;;  %v1367_v52 = vld [vmem:[#allocation2 + $0x120] sm:$0xff]  ;;  %v1382_v31 = vld [vmem:[#allocation5 + $0x110] sm:$0xff] }
 0x64d   :  { %v1246_v56 = vsel %vm1237_vm15, %v3977_v36, -1e+30  ;;  %v1269_v57 = vsel %vm1260_vm5, %v3977_v36, -1e+30  ;;  %v3062_v48 = vpack.c.bf16 %v1381_v41, %v1380_v34  ;;  %vm4475_vm15 = vmmov %vm4471_vm0 }
 0x64e   :  { %v1249_v49 = vmax.f32 %v1246_v56, %v1247_v10  ;;  %v1272_v3 = vmax.f32 %v1269_v57, %v1270_v14  ;;  %3054 = vmatpush3.bf16.msra.mxu0 %v3053_v50  ;;  %3060 = vmatpush3.bf16.msra.mxu1 %v3053_v50  ;;  %v1236_v6 = vmul.f32 %v3991_v59, %v3660_v60  ;;  %v4037_v10 = vld [vmem:[%s4424_s2] sm:$0x3]  ;;  %v1383_v50 = vld [vmem:[#allocation5 + $0x118] sm:$0xff] }
 0x64f   :  { %v1259_v13 = vmul.f32 %v3991_v59, %v3658_v58  ;;  %2706 = vmatprep.subr.mxu0 %v3336_v1  ;;  %2724 = vmatprep.subr.mxu1 %v3336_v1  ;;  %v4004_v29 = vmul.f32 %v1072_v4, %v3991_v59  ;;  %v592_v14 = vmul.f32 %v4037_v10, %v591_v17 }
 0x650   :  { %vm1239_vm7 = vcmp.gt.f32.partialorder %v1236_v6, 0.0  ;;  %v3065_v4 = vpack.c.bf16 %v1383_v50, %v1382_v31  ;;  %v1369_v6 = vld [vmem:[#allocation2 + $0x130] sm:$0xff] }
 0x651   :  { %vm1262_vm9 = vcmp.gt.f32.partialorder %v1259_v13, 0.0  ;;  %v1248_v39 = vsel %vm1239_vm7, %v4004_v29, -1e+30  ;;  %v1370_v13 = vld [vmem:[#allocation2 + $0x138] sm:$0xff] }
 0x652   :  { %2707 = vmatpush3.msra.mxu0 %v4004_v29  ;;  %2725 = vmatpush3.msra.mxu1 %v4004_v29  ;;  %v1271_v62 = vsel %vm1262_vm9, %v4004_v29, -1e+30  ;;  %v1250_v15 = vmax.f32 %v1249_v49, %v1248_v39  ;;  %v3095_v39 = vpack.c.bf16 %v1370_v13, %v1369_v6  ;;  %v1395_v6 = vld [vmem:[#allocation5 + $0x178] sm:$0xff] }
 0x653   :  { %2709 = vmatmul.mubr.msk.f32.vlgmr.msra.gmra.mrb[18].mxu0 %vm4466_vm3, %v1087_v27  ;;  %3055 = vmatprep.subr.bf16.mxu0 %v3334_v0  ;;  %v1273_v19 = vmax.f32 %v1272_v3, %v1271_v62  ;;  %v3234_v3 = vld [vmem:[%s4422_s0 + $0x10] sm:$0xff]  ;;  %vm4476_vm3 = vcmp.lt.s32.totalorder %v3552_v12, %v3550_v11 }
 0x654   :  { %2727 = vmatmul.mubr.msk.f32.vlgmr.msra.gmra.mrb[18].mxu1 %vm4468_vm14, %v3231_v22  ;;  %3057 = vmatpush3.bf16.msra.mxu0 %v3789_v26  ;;  %v1251_v42 = vrot.slane %v1250_v15, 4  ;;  %v3089_v26 = vpack.c.bf16 %v1366_v21, %v1365_v18  ;;  %v1372_v22 = vld [vmem:[#allocation2 + $0x148] sm:$0xff]  ;;  %v1386_v18 = vld [vmem:[#allocation5 + $0x130] sm:$0xff]  ;;  %v1387_v21 = vld [vmem:[#allocation5 + $0x138] sm:$0xff] }
 0x655   :  { %2729 = vmatprep.mubr.msk.f32.mxu1 %vm4453_vm12, %v3336_v1  ;;  %2715 = vmatprep.subr.mxu0 %v3336_v1  ;;  %v1274_v43 = vrot.slane %v1273_v19, 4 }
 0x656   :  { %2717 = vmatprep.mubr.msk.f32.mxu0 %vm4453_vm12, %v3336_v1  ;;  %3085 = vmatprep.subr.bf16.mxu1 %v3334_v0  ;;  %v1252_v23 = vmax.f32 %v1250_v15, %v1251_v42  ;;  %v3068_v15 = vpack.c.bf16 %v1385_v9, %v1384_v7  ;;  %v3071_v42 = vpack.c.bf16 %v1387_v21, %v1386_v18  ;;  %v2286_v18 = vld [vmem:[%s4427_s5 + $0x2] ss:$0 sm:$0xff] }
 0x657   :  { %3087 = vmatpush3.bf16.msra.mxu1 %v3086_v33  ;;  %v1275_v54 = vmax.f32 %v1273_v19, %v1274_v43  ;;  %v1371_v19 = vld [vmem:[#allocation2 + $0x140] sm:$0xff]  ;;  %v1373_v43 = vld [vmem:[#allocation2 + $0x150] sm:$0xff] }
 0x658   :  { %2730 = vmatmul.mubr.msk.f32.gmra.mrb[20].mxu1 %vm4469_vm1, %v3232_v45  ;;  %2716 = vmatpush3.msra.mxu0 %v3792_v35  ;;  %v1253_v56 = vrot.slane %v1252_v23, 2  ;;  %v3092_v35 = vpack.c.bf16 %v1368_v55, %v1367_v52  ;;  %v3098_v41 = vpack.c.bf16 %v1372_v22, %v1371_v19  ;;  %v1376_v52 = vld [vmem:[#allocation2 + $0x168] sm:$0xff]  ;;  %v1390_v55 = vld [vmem:[#allocation5 + $0x150] sm:$0xff] }
 0x659   :  { %2732 = vmatprep.mubr.msk.f32.mxu1 %vm4453_vm12, %v3336_v1  ;;  %3061 = vmatprep.subr.bf16.mxu0 %v3334_v0  ;;  %v1276_v57 = vrot.slane %v1275_v54, 2 }
 0x65a   :  { %3088 = vmatprep.subr.bf16.mxu1 %v3334_v0  ;;  %v1254_v61 = vmax.f32 %v1252_v23, %v1253_v56  ;;  %v1388_v23 = vld [vmem:[#allocation5 + $0x140] sm:$0xff]  ;;  %v1377_v56 = vld [vmem:[#allocation2 + $0x170] sm:$0xff] }
 0x65b   :  { %2718 = vmatmul.mubr.msk.f32.vlgmr.msra.gmra.mrb[18].mxu0 %vm4470_vm4, %v592_v14  ;;  %3090 = vmatpush3.bf16.msra.mxu1 %v3089_v26  ;;  %v1277_v49 = vmax.f32 %v1275_v54, %v1276_v57  ;;  %v1374_v26 = vld [vmem:[#allocation2 + $0x158] sm:$0xff]  ;;  %v1389_v54 = vld [vmem:[#allocation5 + $0x148] sm:$0xff] }
 0x65c   :  { %2733 = vmatmul.mubr.msk.f32.gmra.mrb[22].mxu1 %vm4471_vm0, %v3234_v3  ;;  %3063 = vmatpush3.bf16.msra.mxu0 %v3062_v48  ;;  %v1255_v28 = vrot.slane %v1254_v61, 1  ;;  %v3101_v45 = vpack.c.bf16 %v1374_v26, %v1373_v43  ;;  %v3074_v48 = vpack.c.bf16 %v1389_v54, %v1388_v23  ;;  %v1391_v14 = vld [vmem:[#allocation5 + $0x158] sm:$0xff]  ;;  %v2288_v43 = vld [vmem:[%s4428_s6 + $0x2] ss:$0 sm:$0xff] }
 0x65d   :  { %3064 = vmatprep.subr.bf16.mxu0 %v3334_v0  ;;  %2767 = vmatprep.mubr.msk.f32.mxu0 %vm4453_vm12, %v3336_v1  ;;  %v1278_v27 = vrot.slane %v1277_v49, 1  ;;  %v3077_v50 = vpack.c.bf16 %v1391_v14, %v1390_v55  ;;  %v1378_v57 = vld [vmem:[#allocation2 + $0x178] sm:$0xff] }
 0x65e   :  { %3091 = vmatprep.subr.bf16.mxu1 %v3334_v0  ;;  %2808 = vmatprep.mubr.msk.f32.mxu1 %vm4453_vm12, %v3336_v1  ;;  %v1256_v62 = vmax.f32 %v1254_v61, %v1255_v28  ;;  %v1393_v61 = vld [vmem:[#allocation5 + $0x168] sm:$0xff] }
 0x65f   :  { %3093 = vmatpush3.bf16.msra.mxu1 %v3092_v35  ;;  %v1279_v33 = vmax.f32 %v1277_v49, %v1278_v27  ;;  %v1392_v35 = vld [vmem:[#allocation5 + $0x160] sm:$0xff]  ;;  %v3107_v49 = vpack.c.bf16 %v1378_v57, %v1377_v56 }
 0x660   :  { %3066 = vmatpush3.bf16.msra.mxu0 %v3065_v4  ;;  %3094 = vmatprep.subr.bf16.mxu1 %v3334_v0  ;;  %v3080_v3 = vpack.c.bf16 %v1393_v61, %v1392_v35  ;;  %v1394_v4 = vld [vmem:[#allocation5 + $0x170] sm:$0xff] }
 0x661   :  { %3067 = vmatprep.subr.bf16.mxu0 %v3334_v0  ;;  %v1280_v17 = vsel %vm4472_vm10, %v1256_v62, %v1279_v33  ;;  %v3083_v13 = vpack.c.bf16 %v1395_v6, %v1394_v4 }
 0x662   :  { %v4056_v34 = vadd.f32 %v1280_v17, %v3827_v24  ;;  %v1375_v24 = vld [vmem:[#allocation2 + $0x160] sm:$0xff] }
 0x663   :  { %3096 = vmatpush3.bf16.msra.mxu1 %v3095_v39  ;;  %v3104_v31 = vpack.c.bf16 %v1376_v52, %v1375_v24 }
 0x664   :  { %3069 = vmatpush3.bf16.msra.mxu0 %v3068_v15  ;;  %3097 = vmatprep.subr.bf16.mxu1 %v3334_v0 }
 0x665   :  { %3070 = vmatprep.subr.bf16.mxu0 %v3334_v0 }
 0x667   :  { %3099 = vmatpush3.bf16.msra.mxu1 %v3098_v41 }
 0x668   :  { %3072 = vmatpush3.bf16.msra.mxu0 %v3071_v42  ;;  %3100 = vmatprep.subr.bf16.mxu1 %v3334_v0 }
 0x669   :  { %3073 = vmatprep.subr.bf16.mxu0 %v3334_v0 }
 0x66b   :  { %3102 = vmatpush3.bf16.msra.mxu1 %v3101_v45 }
 0x66c   :  { %3075 = vmatpush3.bf16.msra.mxu0 %v3074_v48  ;;  %3103 = vmatprep.subr.bf16.mxu1 %v3334_v0 }
 0x66d   :  { %3076 = vmatprep.subr.bf16.mxu0 %v3334_v0 }
 0x66f   :  { %3105 = vmatpush3.bf16.msra.mxu1 %v3104_v31 }
 0x670   :  { %3078 = vmatpush3.bf16.msra.mxu0 %v3077_v50  ;;  %3106 = vmatprep.subr.bf16.mxu1 %v3334_v0 }
 0x671   :  { %3079 = vmatprep.subr.bf16.mxu0 %v3334_v0 }
 0x673   :  { %3108 = vmatpush3.bf16.msra.mxu1 %v3107_v49 }
 0x674   :  { %3081 = vmatpush3.bf16.msra.mxu0 %v3080_v3  ;;  %3112 = vmatprep.subr.bf16.mxu1 %v3334_v0 }
 0x675   :  { %3082 = vmatprep.subr.bf16.mxu0 %v3334_v0 }
 0x678   :  { %3084 = vmatpush3.bf16.msra.mxu0 %v3083_v13 }
 0x679   :  { %3109 = vmatprep.subr.bf16.mxu0 %v3334_v0 }
 0x67b   :  { %2768 = vmatmul.mubr.f32.vlgmr.msra.gmra.mrb[20].mxu0 %v3977_v36 }
 0x67c   :  { %2770 = vmatprep.mubr.msk.f32.mxu0 %vm4453_vm12, %v3336_v1 }
 0x67f   :  { %2771 = vmatmul.mubr.f32.gmra.mrb[22].mxu0 %v3966_v38 }
 0x680   :  { %2773 = vmatprep.mubr.msk.f32.mxu0 %vm4453_vm12, %v3336_v1 }
 0x683   :  { %2774 = vmatmul.mubr.f32.gmra.mrb[24].mxu0 %v4004_v29 }
 0x684   :  { %2823 = vmatprep.mubr.msk.f32.mxu0 %vm4453_vm12, %v3336_v1 }
 0x727   :  { %v1348_v7 = vpop.f32.mrb[18].mxu1 }
 0x728   :  { %v2728_v9 = vpop.f32.mrb[19].mxu1  ;;  %2809 = vmatmul.mubr.f32.vlgmr.msra.gmra.mrb[24].mxu1 %v1348_v7 }
 0x729   :  { %2811 = vmatprep.mubr.msk.f32.mxu1 %vm4453_vm12, %v3336_v1 }
 0x72b   :  { %v1353_v36 = vpop.f32.mrb[20].mxu1 }
 0x72c   :  { %v2731_v28 = vpop.f32.mrb[21].mxu1  ;;  %2812 = vmatmul.mubr.f32.gmra.mrb[26].mxu1 %v1353_v36 }
 0x72d   :  { %2814 = vmatprep.mubr.msk.f32.mxu1 %vm4453_vm12, %v3336_v1 }
 0x72f   :  { %v1358_v38 = vpop.f32.mrb[22].mxu1 }
 0x730   :  { %v2734_v27 = vpop.f32.mrb[23].mxu1  ;;  %2815 = vmatmul.mubr.f32.gmra.mrb[28].mxu1 %v1358_v38 }
 0x731   :  { %2858 = vmatprep.mubr.msk.f32.mxu1 %vm4453_vm12, %v3336_v1 }
 0x74e   :  { %v1462_v29 = vpop.f32.mrb[20].mxu0 }
 0x74f   :  { %v2769_v39 = vpop.f32.mrb[21].mxu0 }
 0x752   :  { %v1467_v62 = vpop.f32.mrb[22].mxu0 }
 0x753   :  { %v2772_v33 = vpop.f32.mrb[23].mxu0 }
 0x756   :  { %v1472_v15 = vpop.f32.mrb[24].mxu0 }
 0x757   :  { %v2775_v19 = vpop.f32.mrb[25].mxu0 }
 0x7fb   :  { %v1542_v22 = vpop.f32.mrb[24].mxu1 }
 0x7fc   :  { %v1543_v21 = vadd.f32 %v1542_v22, %v1462_v29  ;;  %v2810_v17 = vpop.f32.mrb[25].mxu1 }
 0x7fe   :  { %v4087_v41 = vadd.f32 %v2286_v18, %v1543_v21 }
 0x7ff   :  { %v1547_v42 = vpop.f32.mrb[26].mxu1 }
 0x800   :  { %v1567_v26 = vmax.f32 %v4087_v41, 0.0  ;;  %v1548_v23 = vadd.f32 %v1547_v42, %v1467_v62  ;;  %v2813_v54 = vpop.f32.mrb[27].mxu1 }
 0x802   :  { %v4093_v45 = vadd.f32 %v2286_v18, %v1548_v23  ;;  %v1578_v48 = vmul.f32 %v2288_v43, %v1567_v26 }
 0x803   :  { %v1552_v24 = vpop.f32.mrb[28].mxu1 }
 0x804   :  { %v1568_v52 = vmax.f32 %v4093_v45, 0.0  ;;  %v1553_v55 = vadd.f32 %v1552_v24, %v1472_v15  ;;  %v2816_v14 = vpop.f32.mrb[29].mxu1  ;;  %1581 = vadd.xlane.f32.xlu0 %v1578_v48 }
 0x806   :  { %v4098_v31 = vadd.f32 %v2286_v18, %v1553_v55  ;;  %v1579_v50 = vmul.f32 %v2288_v43, %v1568_v52  ;;  %v1660_v55 = vmul.f32 %v3947_v2, %v3670_v63 }
 0x808   :  { %v1569_v56 = vmax.f32 %v4098_v31, 0.0  ;;  %1583 = vadd.xlane.f32.xlu1 %v1579_v50 }
 0x80a   :  { %v1580_v57 = vmul.f32 %v2288_v43, %v1569_v56 }
 0x80c   :  { %1585 = vadd.xlane.f32.xlu0 %v1580_v57 }
 0x891   :  { %v1582_v35 = vpop.xlane.xlu0 %1581 }
 0x892   :  { %3221 = vtanh.f32 %v1582_v35 }
 0x895   :  { %v1584_v61 = vpop.xlane.xlu1 %1583 }
 0x896   :  { %3223 = vtanh.f32 %v1584_v61 }
 0x899   :  { %v1586_v49 = vpop.xlane.xlu0 %1585 }
 0x89a   :  { %3225 = vtanh.f32 %v1586_v49 }
 0x89c   :  { %v4105_v3 = vpop.eup %3221 }
 0x89d   :  { %v1590_v6 = vmul.f32 %v4105_v3, %v3598_v40 }
 0x89f   :  { %v1593_v28 = vsel %vm4474_vm13, %v1590_v6, 0.0 }
 0x8a0   :  { %v4107_v4 = vpop.eup %3223 }
 0x8a1   :  { %v1591_v13 = vmul.f32 %v4107_v4, %v3580_v30  ;;  %v1643_v30 = vrot.slane %v3959_v25, %v3555_v16 }
 0x8a3   :  { %v1594_v7 = vsel %vm4473_vm8, %v1591_v13, 0.0  ;;  %v1644_v21 = vmul.f32 %v1643_v30, %v3697_v37  ;;  %v1646_v23 = vmul.f32 %v1643_v30, %v3699_v5  ;;  %v1866_v13 = vld [vmem:[%s4429_s7 + $0x80] sm:$0xff] }
 0x8a4   :  { %v4114_v9 = vpop.eup %3225  ;;  %v1595_v38 = vadd.f32 %v1594_v7, %v1593_v28  ;;  %v1867_v7 = vld [vmem:[%s4429_s7 + $0x88] sm:$0xff] }
 0x8a5   :  { %v1592_v36 = vmul.f32 %v4114_v9, %v3611_v46  ;;  %v1645_v46 = vmul.f32 %v1643_v30, %v3670_v63  ;;  %v3113_v28 = vpack.c.bf16 %v1867_v7, %v1866_v13  ;;  %v1874_v30 = vld [vmem:[%s4429_s7 + $0xc0] sm:$0xff] }
 0x8a7   :  { %v1596_v27 = vsel %vm4475_vm15, %v1592_v36, 0.0  ;;  %v1868_v36 = vld [vmem:[%s4429_s7 + $0x90] sm:$0xff]  ;;  %3114 = vmatpush3.bf16.msra.mxu1 %v3113_v28  ;;  %v1684_v28 = vmul.f32 7.0, %v3658_v58 }
 0x8a8   :  { %v1597_v29 = vadd.f32 %v1596_v27, %v1595_v38  ;;  %v1869_v38 = vld [vmem:[%s4429_s7 + $0x98] sm:$0xff]  ;;  %3115 = vmatprep.subr.bf16.mxu1 %v3334_v0 }
 0x8a9   :  { %v3116_v27 = vpack.c.bf16 %v1869_v38, %v1868_v36 }
 0x8aa   :  { %v1598_v39 = vrot.slane %v1597_v29, 4 }
 0x8ab   :  { %3117 = vmatpush3.bf16.msra.mxu1 %v3116_v27 }
 0x8ac   :  { %v1599_v62 = vadd.f32 %v1598_v39, %v1597_v29  ;;  %v1870_v29 = vld [vmem:[%s4429_s7 + $0xa0] sm:$0xff]  ;;  %v1871_v39 = vld [vmem:[%s4429_s7 + $0xa8] sm:$0xff]  ;;  %3118 = vmatprep.subr.bf16.mxu1 %v3334_v0 }
 0x8ae   :  { %v1600_v33 = vrot.slane %v1599_v62, 2 }
 0x8b0   :  { %v1601_v40 = vadd.f32 %v1600_v33, %v1599_v62  ;;  %v3119_v62 = vpack.c.bf16 %v1871_v39, %v1870_v29  ;;  %v1872_v33 = vld [vmem:[%s4429_s7 + $0xb0] sm:$0xff]  ;;  %v1678_v29 = vmul.f32 7.0, %v3660_v60 }
 0x8b2   :  { %v1602_v15 = vrot.slane %v1601_v40, 1  ;;  %3120 = vmatpush3.bf16.msra.mxu1 %v3119_v62 }
 0x8b3   :  { %3121 = vmatprep.subr.bf16.mxu1 %v3334_v0 }
 0x8b4   :  { %v1603_v19 = vadd.f32 %v1602_v15, %v1601_v40  ;;  %v1873_v40 = vld [vmem:[%s4429_s7 + $0xb8] sm:$0xff] }
 0x8b5   :  { %v3122_v15 = vpack.c.bf16 %v1873_v40, %v1872_v33  ;;  %v1711_v33 = vmul.f32 %v4107_v4, %v1568_v52 }
 0x8b6   :  { %vm1605_vm5 = vcmp.gt.f32.partialorder %v1603_v19, %v4107_v4  ;;  %vm1608_vm7 = vcmp.eq.f32.partialorder %v1603_v19, %v4107_v4  ;;  %vm1607_vm9 = vcmp.eq.f32.partialorder %v1603_v19, %v4105_v3  ;;  %vm1604_vm1 = vcmp.gt.f32.partialorder %v1603_v19, %v4105_v3 }
 0x8b7   :  { %vm1611_vm14 = vmand %vm1608_vm7, %vm4476_vm3  ;;  %vm1609_vm4 = vcmp.eq.f32.partialorder %v1603_v19, %v4114_v9  ;;  %vm1623_vm10 = vcmp.gt.f32.partialorder %v4107_v4, %v1603_v19  ;;  %vm1625_vm15 = vcmp.eq.f32.partialorder %v4105_v3, %v1603_v19  ;;  %vm1626_vm6 = vcmp.eq.f32.partialorder %v4107_v4, %v1603_v19  ;;  %3123 = vmatpush3.bf16.msra.mxu1 %v3122_v15 }
 0x8b8   :  { %vm1614_vm8 = vmor %vm1605_vm5, %vm1611_vm14  ;;  %vm1627_vm2 = vcmp.eq.f32.partialorder %v4114_v9, %v1603_v19  ;;  %vm4477_vm7 = vcmp.lt.s32.totalorder %v3552_v12, %v3544_v8  ;;  %vm1606_vm11 = vcmp.gt.f32.partialorder %v1603_v19, %v4114_v9  ;;  %vm4478_vm5 = vcmp.lt.s32.totalorder %v3552_v12, %v3585_v32  ;;  %3124 = vmatprep.subr.bf16.mxu1 %v3334_v0 }
 0x8b9   :  { %v2290_v22 = vsel %vm1614_vm8, 1.0, %v3336_v1  ;;  %vm1610_vm3 = vmand %vm1607_vm9, %vm4477_vm7  ;;  %vm4479_vm9 = vcmp.lt.s32.totalorder %v3544_v8, %v3552_v12  ;;  %v1659_v8 = vmul.f32 %v3973_v20, %v3697_v37  ;;  %v1710_v15 = vmul.f32 %v4105_v3, %v1567_v26 }
 0x8ba   :  { %v1648_v18 = vmul.f32 %v2290_v22, %v1645_v46  ;;  %vm1613_vm0 = vmor %vm1604_vm1, %vm1610_vm3  ;;  %v1876_v22 = vld [vmem:[%s4429_s7 + $0xd0] sm:$0xff] }
 0x8bb   :  { %v2289_v17 = vsel %vm1613_vm0, 1.0, %v3336_v1  ;;  %vm1612_vm14 = vmand %vm1609_vm4, %vm4478_vm5  ;;  %vm4481_vm4 = vcmp.lt.s32.totalorder %v3550_v11, %v3552_v12 }
 0x8bc   :  { %v1653_v42 = vsel %vm4474_vm13, %v1648_v18, 0.0  ;;  %v1647_v43 = vmul.f32 %v2289_v17, %v1644_v21  ;;  %vm1615_vm8 = vmor %vm1606_vm11, %vm1612_vm14  ;;  %v1877_v18 = vld [vmem:[%s4429_s7 + $0xd8] sm:$0xff]  ;;  %v1878_v17 = vld [vmem:[%s4429_s7 + $0xe0] sm:$0xff] }
 0x8bd   :  { %1654 = vadd.xlane.f32.xlu0 %v1653_v42  ;;  %v2291_v54 = vsel %vm1615_vm8, 1.0, %v3336_v1  ;;  %vm1628_vm1 = vmand %vm1625_vm15, %vm4479_vm9  ;;  %vm4483_vm15 = vcmp.gt.f32.partialorder %v4105_v3, %v1603_v19  ;;  %v3128_v21 = vpack.c.bf16 %v1877_v18, %v1876_v22  ;;  %v1879_v42 = vld [vmem:[%s4429_s7 + $0xe8] sm:$0xff]  ;;  %v1687_v18 = vadd.f32 %v1684_v28, %v1678_v29 }
 0x8be   :  { %vm4480_vm0 = vmmov %vm4474_vm13  ;;  %v1649_v24 = vmul.f32 %v2291_v54, %v1646_v23  ;;  %vm4482_vm13 = vcmp.lt.s32.totalorder %v3585_v32, %v3552_v12  ;;  %v1661_v12 = vmul.f32 %v3991_v59, %v3699_v5  ;;  %v1880_v23 = vld [vmem:[%s4429_s7 + $0xf0] sm:$0xff]  ;;  %v1881_v54 = vld [vmem:[%s4429_s7 + $0xf8] sm:$0xff]  ;;  %v1712_v3 = vmul.f32 %v4114_v9, %v1569_v56 }
 0x8bf   :  { %v1650_v48 = vsel %vm4480_vm0, %v1647_v43, 0.0  ;;  %vm1629_vm11 = vmand %vm1626_vm6, %vm4481_vm4  ;;  %v3131_v43 = vpack.c.bf16 %v1879_v42, %v1878_v17 }
 0x8c0   :  { %1651 = vadd.xlane.f32.xlu1 %v1650_v48  ;;  %vm1630_vm7 = vmand %vm1627_vm2, %vm4482_vm13  ;;  %vm4485_vm2 = vcmp.gt.f32.partialorder %v4114_v9, %v1603_v19  ;;  %v1875_v19 = vld [vmem:[%s4429_s7 + $0xc8] sm:$0xff]  ;;  %v3134_v48 = vpack.c.bf16 %v1881_v54, %v1880_v23 }
 0x8c1   :  { %vm1631_vm3 = vmor %vm4483_vm15, %vm1628_vm1  ;;  %v3125_v46 = vpack.c.bf16 %v1875_v19, %v1874_v30 }
 0x8c2   :  { %vm1632_vm5 = vmor %vm1623_vm10, %vm1629_vm11  ;;  %v2292_v11 = vsel %vm1631_vm3, 1.0, %v3336_v1 }
 0x8c3   :  { %vm4484_vm6 = vmmov %vm4480_vm0  ;;  %v2293_v37 = vsel %vm1632_vm5, 1.0, %v3336_v1  ;;  %v1662_v14 = vmul.f32 %v2292_v11, %v1659_v8  ;;  %3126 = vmatpush3.bf16.msra.mxu1 %v3125_v46 }
 0x8c4   :  { %v1656_v32 = vsel %vm4484_vm6, %v1649_v24, 0.0  ;;  %vm1633_vm14 = vmor %vm4485_vm2, %vm1630_vm7  ;;  %v1663_v63 = vmul.f32 %v2293_v37, %v1660_v55  ;;  %3127 = vmatprep.subr.bf16.mxu1 %v3334_v0 }
 0x8c5   :  { %1657 = vadd.xlane.f32.xlu1 %v1656_v32  ;;  %v2294_v50 = vsel %vm1633_vm14, 1.0, %v3336_v1  ;;  %vm4486_vm8 = vmmov %vm4480_vm0  ;;  %vm4490_vm14 = vcmask 1040384  }
 0x8c6   :  { %v1664_v57 = vmul.f32 %v2294_v50, %v1661_v12  ;;  %v1665_v35 = vsel %vm4486_vm8, %v1662_v14, 0.0  ;;  %vm4487_vm10 = vmmov %vm4480_vm0  ;;  %v1688_v12 = vmul.f32 7.0, %v4037_v10 }
 0x8c7   :  { %v1666_v61 = vsel %vm4487_vm10, %v1663_v63, 0.0  ;;  %vm4488_vm9 = vmmov %vm4480_vm0  ;;  %3129 = vmatpush3.bf16.msra.mxu1 %v3128_v21  ;;  %v1716_v63 = vmul.f32 0.14285715, %v4037_v10 }
 0x8c8   :  { %v1667_v49 = vadd.f32 %v1666_v61, %v1665_v35  ;;  %v1668_v5 = vsel %vm4488_vm9, %v1664_v57, 0.0  ;;  %3130 = vmatprep.subr.bf16.mxu1 %v3334_v0  ;;  %v1691_v37 = vrot.slane %v1688_v12, 1  ;;  %v1677_v57 = vmul.f32 7.0, %v3645_v44  ;;  %vm4489_vm2 = vmmov %vm4486_vm8 }
 0x8c9   :  { %v1683_v35 = vmul.f32 7.0, %v3650_v51  ;;  %v1676_v61 = vmul.f32 7.0, %v3647_v47  ;;  %vm2214_vm8 = vcmask 1041408  }
 0x8ca   :  { %v1669_v6 = vadd.f32 %v1668_v5, %v1667_v49  ;;  %v1693_v50 = vadd.f32 %v1691_v37, %v1688_v12  ;;  %v1682_v49 = vmul.f32 7.0, %v3652_v53  ;;  %v1719_v5 = vrot.slane %v1716_v63, 1  ;;  %v1855_v37 = vld [vmem:[%s4429_s7 + $0x28] sm:$0xff] }
 0x8cb   :  { %3132 = vmatpush3.bf16.msra.mxu1 %v3131_v43 }
 0x8cc   :  { %3133 = vmatprep.subr.bf16.mxu1 %v3334_v0  ;;  %v1670_v24 = vrot.slane %v1669_v6, 4  ;;  %v1685_v36 = vadd.f32 %v1682_v49, %v1676_v61  ;;  %v1721_v62 = vadd.f32 %v1719_v5, %v1716_v63  ;;  %v1856_v61 = vld [vmem:[%s4429_s7 + $0x30] sm:$0xff]  ;;  %v1857_v49 = vld [vmem:[%s4429_s7 + $0x38] sm:$0xff] }
 0x8ce   :  { %v1671_v8 = vadd.f32 %v1670_v24, %v1669_v6  ;;  %v1686_v6 = vadd.f32 %v1683_v35, %v1677_v57  ;;  %v1853_v24 = vld [vmem:[%s4429_s7 + $0x18] sm:$0xff] }
 0x8cf   :  { %3135 = vmatpush3.bf16.msra.mxu1 %v3134_v48  ;;  %v1852_v48 = vld [vmem:[%s4429_s7 + $0x10] sm:$0xff] }
 0x8d0   :  { %3160 = vmatprep.subr.bf16.mxu1 %v3334_v0  ;;  %v1672_v55 = vrot.slane %v1671_v8, 2 }
 0x8d2   :  { %v1673_v11 = vadd.f32 %v1672_v55, %v1671_v8 }
 0x8d4   :  { %v1674_v32 = vrot.slane %v1673_v11, 1 }
 0x8d6   :  { %v1675_v14 = vadd.f32 %v1674_v32, %v1673_v11  ;;  %v3140_v11 = vpack.c.bf16 %v1853_v24, %v1852_v48  ;;  %v1854_v32 = vld [vmem:[%s4429_s7 + $0x20] sm:$0xff]  ;;  %v2045_v48 = vld [vmem:[%s4431_s9 + $0x70] sm:$0xff] }
 0x8d7   :  { %v3143_v63 = vpack.c.bf16 %v1855_v37, %v1854_v32  ;;  %v2129_v37 = vld [vmem:[#allocation7 + $0x20] sm:$0xff] }
 0x8d8   :  { %vm1706_vm1 = vcmp.lt.f32.partialorder %v1675_v14, %v1693_v50 }
 0x8d9   :  { %v2298_v13 = vsel %vm1706_vm1, 1.0, %v3336_v1 }
 0x8da   :  { %v1709_v39 = vmul.f32 %v2298_v13, %v3959_v25  ;;  %v3146_v13 = vpack.c.bf16 %v1857_v49, %v1856_v61 }
 0x8dc   :  { %v1722_v21 = vmul.f32 %v1721_v62, %v1709_v39  ;;  %v1860_v62 = vld [vmem:[%s4429_s7 + $0x50] sm:$0xff] }
 0x8de   :  { %v1726_v42 = vrot.slane %v1722_v21, %v3555_v16  ;;  %v2032_v21 = vld [vmem:[%s4431_s9 + $0x8] sm:$0xff] }
 0x94a   :  { %v1655_v7 = vpop.xlane.xlu0 %1654 }
 0x94b   :  { %vm1695_vm0 = vcmp.lt.f32.partialorder %v1655_v7, %v1686_v6  ;;  %v1858_v7 = vld [vmem:[%s4429_s7 + $0x40] sm:$0xff] }
 0x94c   :  { %v2296_v38 = vsel %vm1695_vm0, 1.0, %v3336_v1 }
 0x94d   :  { %v1652_v27 = vpop.xlane.xlu1 %1651  ;;  %v1704_v40 = vmul.f32 %v2296_v38, %v3947_v2 }
 0x94e   :  { %vm1694_vm4 = vcmp.lt.f32.partialorder %v1652_v27, %v1685_v36  ;;  %v1859_v36 = vld [vmem:[%s4429_s7 + $0x48] sm:$0xff] }
 0x94f   :  { %v2295_v30 = vsel %vm1694_vm4, 1.0, %v3336_v1  ;;  %v1714_v19 = vmul.f32 %v1711_v33, %v1704_v40  ;;  %v1803_v46 = vmul.f32 %v1704_v40, %v3645_v44  ;;  %v1826_v22 = vmul.f32 %v1704_v40, %v3650_v51  ;;  %v1861_v33 = vld [vmem:[%s4429_s7 + $0x58] sm:$0xff] }
 0x950   :  { %v1703_v25 = vmul.f32 %v2295_v30, %v3973_v20  ;;  %v3149_v39 = vpack.c.bf16 %v1859_v36, %v1858_v7  ;;  %v3152_v30 = vpack.c.bf16 %v1861_v33, %v1860_v62  ;;  %v2301_v36 = vld [vmem:[%s4432_s10] ss:$0 sm:$0xff]  ;;  %s3337_s10 = smov [#allocation8]  }
 0x951   :  { %vm1806_vm11 = vcmp.gt.f32.partialorder %v1803_v46, 0.0  ;;  %vm1829_vm13 = vcmp.gt.f32.partialorder %v1826_v22, 0.0  ;;  %v1863_v46 = vld [vmem:[%s4429_s7 + $0x68] sm:$0xff]  ;;  %s2235_s17 = sshll.u32 %s3337_s10, 4  ;;  %s2236_s17 = int_to_ptr.vmem [resolvable:$true] %s2235_s17 }
 0x952   :  { %v1658_v45 = vpop.xlane.xlu1 %1657  ;;  %v1713_v2 = vmul.f32 %v1710_v15, %v1703_v25  ;;  %v1802_v52 = vmul.f32 %v1703_v25, %v3647_v47  ;;  %v1815_v41 = vsel %vm1806_vm11, %v1714_v19, -1e+30  ;;  %v1825_v26 = vmul.f32 %v1703_v25, %v3652_v53  ;;  %v1850_v47 = vld [vmem:[%s4429_s7] sm:$0xff]  ;;  %v1851_v53 = vld [vmem:[%s4429_s7 + $0x8] sm:$0xff]  ;;  %v1865_v25 = vld [vmem:[%s4429_s7 + $0x78] sm:$0xff]  ;;  %p3306_p11 = scmp.lt.s32.totalorder %s2236_s17, %s2236_s17 }
 0x953   :  { %vm1696_vm7 = vcmp.lt.f32.partialorder %v1658_v45, %v1687_v18  ;;  %v1838_v44 = vsel %vm1829_vm13, %v1714_v19, -1e+30  ;;  %v3137_v16 = vpack.c.bf16 %v1851_v53, %v1850_v47  ;;  %v2031_v45 = vld [vmem:[%s4431_s9] sm:$0xff]  ;;  %v2040_v53 = vld [vmem:[%s4431_s9 + $0x48] sm:$0xff] }
 0x954   :  { %vm1805_vm15 = vcmp.gt.f32.partialorder %v1802_v52, 0.0  ;;  %v2297_v51 = vsel %vm1696_vm7, 1.0, %v3336_v1  ;;  %v3110_v20 = vpack.c.bf16 %v1714_v19, %v1713_v2  ;;  %vm1828_vm3 = vcmp.gt.f32.partialorder %v1825_v26, 0.0  ;;  %v1862_v19 = vld [vmem:[%s4429_s7 + $0x60] sm:$0xff]  ;;  %v2033_v52 = vld [vmem:[%s4431_s9 + $0x10] sm:$0xff] }
 0x955   :  { %v1814_v4 = vsel %vm1805_vm15, %v1713_v2, -1e+30  ;;  %v1705_v17 = vmul.f32 %v2297_v51, %v3991_v59  ;;  %v1837_v56 = vsel %vm1828_vm3, %v1713_v2, -1e+30  ;;  %v1727_v59 = vmul.f32 %v4037_v10, %v1726_v42  ;;  %v2035_v51 = vld [vmem:[%s4431_s9 + $0x20] sm:$0xff] }
 0x956   :  { %v1817_v31 = vmax.f32 %v1814_v4, %v1815_v41  ;;  %3111 = vmatpush3.bf16.msra.mxu0 %v3110_v20  ;;  %v1840_v9 = vmax.f32 %v1837_v56, %v1838_v44  ;;  %v3155_v22 = vpack.c.bf16 %v1863_v46, %v1862_v19  ;;  %v3161_v2 = vpack.c.bf16 %v2032_v21, %v2031_v45  ;;  %v2034_v41 = vld [vmem:[%s4431_s9 + $0x18] sm:$0xff]  ;;  %v2036_v20 = vld [vmem:[%s4431_s9 + $0x28] sm:$0xff]  ;;  %v2039_v47 = vld [vmem:[%s4431_s9 + $0x40] sm:$0xff] }
 0x957   :  { %v1715_v43 = vmul.f32 %v1712_v3, %v1705_v17  ;;  %v1804_v23 = vmul.f32 %v1705_v17, %v3660_v60  ;;  %v1827_v54 = vmul.f32 %v1705_v17, %v3658_v58  ;;  %2821 = vmatprep.subr.mxu0 %v3336_v1  ;;  %v3164_v44 = vpack.c.bf16 %v2034_v41, %v2033_v52  ;;  %v2037_v17 = vld [vmem:[%s4431_s9 + $0x30] sm:$0xff] }
 0x958   :  { %v3167_v4 = vpack.c.bf16 %v2036_v20, %v2035_v51  ;;  %v2041_v56 = vld [vmem:[%s4431_s9 + $0x50] sm:$0xff] }
 0x959   :  { %vm1807_vm5 = vcmp.gt.f32.partialorder %v1804_v23, 0.0  ;;  %vm1830_vm6 = vcmp.gt.f32.partialorder %v1827_v54, 0.0 }
 0x95a   :  { %v1816_v8 = vsel %vm1807_vm5, %v1715_v43, -1e+30  ;;  %v1839_v55 = vsel %vm1830_vm6, %v1715_v43, -1e+30  ;;  %2822 = vmatpush3.msra.mxu0 %v1715_v43 }
 0x95b   :  { %v1818_v60 = vmax.f32 %v1817_v31, %v1816_v8  ;;  %v1841_v58 = vmax.f32 %v1840_v9, %v1839_v55  ;;  %2824 = vmatmul.mubr.msk.f32.vlgmr.msra.gmra.mrb[18].mxu0 %vm4489_vm2, %v1727_v59  ;;  %3136 = vmatprep.subr.bf16.mxu0 %v3334_v0  ;;  %v3173_v31 = vpack.c.bf16 %v2040_v53, %v2039_v47  ;;  %v2042_v9 = vld [vmem:[%s4431_s9 + $0x58] sm:$0xff]  ;;  %v2044_v59 = vld [vmem:[%s4431_s9 + $0x68] sm:$0xff]  ;;  %v2125_v55 = vld [vmem:[#allocation7] sm:$0xff] }
 0x95c   :  { %3138 = vmatpush3.bf16.msra.mxu0 %v3137_v16  ;;  %2893 = vmatprep.mubr.msk.f32.mxu0 %vm4453_vm12, %v3336_v1  ;;  %v3176_v43 = vpack.c.bf16 %v2042_v9, %v2041_v56  ;;  %v2043_v16 = vld [vmem:[%s4431_s9 + $0x60] sm:$0xff]  ;;  %v2046_v8 = vld [vmem:[%s4431_s9 + $0x78] sm:$0xff] }
 0x95d   :  { %v1819_v10 = vrot.slane %v1818_v60, 4  ;;  %v1842_v12 = vrot.slane %v1841_v58, 4  ;;  %3139 = vmatprep.subr.bf16.mxu0 %v3334_v0  ;;  %v3179_v24 = vpack.c.bf16 %v2044_v59, %v2043_v16 }
 0x95f   :  { %v1820_v14 = vmax.f32 %v1818_v60, %v1819_v10  ;;  %v1843_v50 = vmax.f32 %v1841_v58, %v1842_v12  ;;  %v2126_v60 = vld [vmem:[#allocation7 + $0x8] sm:$0xff]  ;;  %v2127_v58 = vld [vmem:[#allocation7 + $0x10] sm:$0xff]  ;;  %v2128_v12 = vld [vmem:[#allocation7 + $0x18] sm:$0xff] }
 0x960   :  { %3141 = vmatpush3.bf16.msra.mxu0 %v3140_v11  ;;  %v3182_v11 = vpack.c.bf16 %v2046_v8, %v2045_v48  ;;  %v3185_v10 = vpack.c.bf16 %v2126_v60, %v2125_v55  ;;  %v3188_v32 = vpack.c.bf16 %v2128_v12, %v2127_v58 }
 0x961   :  { %v1821_v57 = vrot.slane %v1820_v14, 2  ;;  %v1844_v35 = vrot.slane %v1843_v50, 2  ;;  %3142 = vmatprep.subr.bf16.mxu0 %v3334_v0 }
 0x963   :  { %v1822_v5 = vmax.f32 %v1820_v14, %v1821_v57  ;;  %v1845_v6 = vmax.f32 %v1843_v50, %v1844_v35  ;;  %v2130_v14 = vld [vmem:[#allocation7 + $0x28] sm:$0xff]  ;;  %v2300_v57 = vld [vmem:[%s4430_s8] ss:$0 sm:$0xff] }
 0x964   :  { %3144 = vmatpush3.bf16.msra.mxu0 %v3143_v63  ;;  %v3191_v50 = vpack.c.bf16 %v2130_v14, %v2129_v37 }
 0x965   :  { %3145 = vmatprep.subr.bf16.mxu0 %v3334_v0  ;;  %v1823_v28 = vrot.slane %v1822_v5, 1  ;;  %v1846_v38 = vrot.slane %v1845_v6, 1 }
 0x967   :  { %v1824_v27 = vmax.f32 %v1822_v5, %v1823_v28  ;;  %v1847_v29 = vmax.f32 %v1845_v6, %v1846_v38  ;;  %v2131_v6 = vld [vmem:[#allocation7 + $0x30] sm:$0xff] }
 0x968   :  { %3147 = vmatpush3.bf16.msra.mxu0 %v3146_v13  ;;  %v2132_v13 = vld [vmem:[#allocation7 + $0x38] sm:$0xff] }
 0x969   :  { %3148 = vmatprep.subr.bf16.mxu0 %v3334_v0  ;;  %v1848_v40 = vsel %vm4490_vm14, %v1824_v27, %v1847_v29  ;;  %v3194_v7 = vpack.c.bf16 %v2132_v13, %v2131_v6  ;;  %v2302_v29 = vld [vmem:[%s4434_s12] ss:$0 sm:$0xff]  ;;  %s3301_s12 = scalar_lea.vmem %s2236_s17, 32 }
 0x96a   :  { %v1849_v15 = vadd.f32 %v1848_v40, %v4056_v34  ;;  %v1864_v34 = vld [vmem:[%s4429_s7 + $0x70] sm:$0xff]  ;;  %p3302_p10 = scmp.ne.s32.totalorder %s2236_s17, %s3301_s12  ;;  %p3307_p12 = scmp.lt.s32.totalorder %s3301_s12, %s3301_s12 }
 0x96b   :  { %v3158_v18 = vpack.c.bf16 %v1865_v25, %v1864_v34 }
 0x96c   :  { %3150 = vmatpush3.bf16.msra.mxu0 %v3149_v39  ;;  %p3308_p13 = por %p3307_p12, %p3306_p11 }
 0x96d   :  { %3151 = vmatprep.subr.bf16.mxu0 %v3334_v0 }
 0x96e   :  { %p3309_p0 = pnand %p3308_p13, %p3302_p10 }
 0x970   :  { %3153 = vmatpush3.bf16.msra.mxu0 %v3152_v30 }
 0x971   :  { %3154 = vmatprep.subr.bf16.mxu0 %v3334_v0 }
 0x974   :  { %3156 = vmatpush3.bf16.msra.mxu0 %v3155_v22 }
 0x975   :  { %3157 = vmatprep.subr.bf16.mxu0 %v3334_v0 }
 0x978   :  { %3159 = vmatpush3.bf16.msra.mxu0 %v3158_v18 }
 0x979   :  { %3184 = vmatprep.subr.bf16.mxu0 %v3334_v0 }
 0x97b   :  { %2894 = vmatmul.mubr.f32.vlgmr.msra.gmra.mrb[26].mxu0 %v1849_v15 }
 0x97c   :  { %2947 = vmatprep.mubr.msk.f32.mxu0 %vm4453_vm12, %v3336_v1  ;;  %3186 = vmatpush3.bf16.msra.mxu0 %v3185_v10 }
 0x97d   :  { %3187 = vmatprep.subr.bf16.mxu0 %v3334_v0 }
 0x980   :  { %3189 = vmatpush3.bf16.msra.mxu0 %v3188_v32 }
 0x981   :  { %3190 = vmatprep.subr.bf16.mxu0 %v3334_v0 }
 0x984   :  { %3192 = vmatpush3.bf16.msra.mxu0 %v3191_v50 }
 0x985   :  { %3193 = vmatprep.subr.bf16.mxu0 %v3334_v0 }
 0x988   :  { %3195 = vmatpush3.bf16.msra.mxu0 %v3194_v7 }
 0xa2e   :  { %v1797_v26 = vpop.f32.mrb[18].mxu0 }
 0xa2f   :  { %v2825_v3 = vpop.f32.mrb[19].mxu0  ;;  %2859 = vmatmul.mubr.f32.vlgmr.msra.gmra.mrb[30].mxu1 %v1797_v26 }
 0xa30   :  { %3162 = vmatpush3.bf16.msra.mxu1 %v3161_v2  ;;  %2928 = vmatprep.mubr.msk.f32.mxu1 %vm4453_vm12, %v3336_v1  ;;  %v2038_v1 = vld [vmem:[%s4431_s9 + $0x38] sm:$0xff]  ;;  %vm2140_vm12 = vcmask 523264  }
 0xa31   :  { %3163 = vmatprep.subr.bf16.mxu1 %v3334_v0  ;;  %v3170_v42 = vpack.c.bf16 %v2038_v1, %v2037_v17 }
 0xa34   :  { %3165 = vmatpush3.bf16.msra.mxu1 %v3164_v44 }
 0xa35   :  { %3166 = vmatprep.subr.bf16.mxu1 %v3334_v0 }
 0xa38   :  { %3168 = vmatpush3.bf16.msra.mxu1 %v3167_v4 }
 0xa39   :  { %3169 = vmatprep.subr.bf16.mxu1 %v3334_v0 }
 0xa3c   :  { %3171 = vmatpush3.bf16.msra.mxu1 %v3170_v42 }
 0xa3d   :  { %3172 = vmatprep.subr.bf16.mxu1 %v3334_v0 }
 0xa40   :  { %3174 = vmatpush3.bf16.msra.mxu1 %v3173_v31 }
 0xa41   :  { %3175 = vmatprep.subr.bf16.mxu1 %v3334_v0 }
 0xa44   :  { %3177 = vmatpush3.bf16.msra.mxu1 %v3176_v43 }
 0xa45   :  { %3178 = vmatprep.subr.bf16.mxu1 %v3334_v0 }
 0xa48   :  { %3180 = vmatpush3.bf16.msra.mxu1 %v3179_v24 }
 0xa49   :  { %3181 = vmatprep.subr.bf16.mxu1 %v3334_v0 }
 0xa4c   :  { %3183 = vmatpush3.bf16.msra.mxu1 %v3182_v11 }
 0xa4e   :  { %v2018_v23 = vpop.f32.mrb[26].mxu0 }
 0xa4f   :  { %v2895_v54 = vpop.f32.mrb[27].mxu0 }
 0xb02   :  { %v1948_v63 = vpop.f32.mrb[30].mxu1 }
 0xb03   :  { %v2019_v35 = vadd.f32 %v2018_v23, %v1948_v63  ;;  %v2860_v61 = vpop.f32.mrb[31].mxu1 }
 0xb05   :  { %v2029_v49 = vadd.f32 %v2300_v57, %v2019_v35 }
 0xb07   :  { %v2030_v5 = vmax.f32 %v2029_v49, 0.0 }
 0xb09   :  { %2929 = vmatmul.mubr.f32.vlgmr.msra.gmra.mrb[32].mxu1 %v2030_v5 }
 0xbdc   :  { %v2120_v28 = vpop.f32.mrb[32].mxu1 }
 0xbdd   :  { %v2121_v0 = vadd.f32 %v2301_v36, %v2120_v28  ;;  %v2930_v38 = vpop.f32.mrb[33].mxu1 }
 0xbdf   :  { %v2124_v27 = vmax.f32 %v2121_v0, 0.0 }
 0xbe1   :  { %2948 = vmatmul.mubr.msk.f32.vlgmr.msra.gmra.mrb[28].mxu0 %vm2140_vm12, %v2124_v27 }
 0xcb4   :  { %v2210_v39 = vpop.f32.mrb[28].mxu0 }
 0xcb5   :  { %v2211_v62 = vadd.f32 %v2302_v29, %v2210_v39  ;;  %v2949_v33 = vpop.f32.mrb[29].mxu0 }
 0xcb7   :  { %v2215_v40 = vsel %vm2214_vm8, %v2211_v62, -inf }
 0xcb8   :  { %2216 = vmax.xlane.f32.xlu0 %v2215_v40 }
 0xd45   :  { %v2217_v15 = vpop.xlane.xlu0 %2216 }
 0xd46   :  { %v2218_v30 = vsub.f32 %v2211_v62, %v2217_v15 }
 0xd48   :  { %v2219_v19 = vmul.f32 1.442695, %v2218_v30 }
 0xd4a   :  { %3227 = vpow2.f32 %v2219_v19 }
 0xd54   :  { %v3228_v46 = vpop.eup %3227 }
 0xd55   :  { %v2221_v22 = vsel %vm2214_vm8, %v3228_v46, 0.0 }
 0xd56   :  { %2222 = vadd.xlane.f32.xlu1 %v2221_v22 }
 0xde3   :  { %v2223_v34 = vpop.xlane.xlu1 %2222 }
 0xde4   :  { %3229 = vlog2.f32 %v2223_v34 }
 0xdee   :  { %v3230_v25 = vpop.eup %3229 }
 0xdef   :  { %v2225_v18 = vmul.f32 0.6931472, %v3230_v25 }
 0xdf1   :  { %v2226_v45 = vadd.f32 %v2225_v18, %v2217_v15 }
 0xdf3   :  { %v2227_v21 = vsub.f32 %v2211_v62, %v2226_v45 }
 0xdf5   :  { %2228 = vst [vmem:[#allocation8] sm:$0x3] %v2227_v21 }
 0xdf6   :  { %3312 = shalt.err (!%p3309_p0)
}
 0xdf7   :  { %s3313_s6 = scalar_lea.hbm %s4435_s13, 32 }
 0xdf8   :  { %p3314_p1 = scmp.ne.s32.totalorder %s4435_s13, %s3313_s6  ;;  %p3317_p2 = scmp.lt.u32.totalorder %s3313_s6, %s4435_s13 }
 0xdfa   :  { %p3319_p3 = pnand %p3317_p2, %p3314_p1 }
 0xdfc   :  { %3322 = shalt.err (!%p3319_p3)
}
 0xdfd   :  { %2238 = dma.vmem_to_hbm [thread:$0]  %s2236_s17, 32, %s4435_s13, [#allocation4]  }
 0xdfe   :  { %3327 = dma.done.wait [#allocation4], 32  }
 0xdff   :  { %3328 = vsyncadd [#allocation4], 4294967264 }
 0xe00   :  { %2242 = vsyncpa [#allocation3], 1 }
 0xe01   :  { %2243 = vsyncpa [#allocation6], 1 }
 0xe02   :  { %2244 = vsyncpa [#allocation4], 1 }

</bundles_post_ra>
